<compile_context>
chip_gen: v5e
topology: v5e:2x2
jax: 0.10.0
libtpu: 0.0.40
codegen_flags: <defaults>
</compile_context>

<pallas_src>
import functools

import jax
import jax.numpy as jnp
from jax.experimental import pallas as pl
from jax.experimental.pallas import tpu as pltpu

LEAKY_SLOPE = 0.01                 # cfg.leaky_slope (deterministic stand-in)
RMS_EPS = 1.1920929e-07            # torch RMSNorm default: finfo(float32).eps


def _round_up(x, m):
    return ((x + m - 1) // m) * m


def _choose_tile(num_edges, tile_e):
    """Pick the edge-tile size (multiple of 128, >=2 grid steps if possible)."""
    e_pad_min = _round_up(max(num_edges, 1), 128)
    tile = min(_round_up(tile_e, 128), e_pad_min)
    # v7x has 2 TensorCores per chip: with only 1 grid step one core idles.
    if e_pad_min // tile < 2 and e_pad_min > 128:
        tile = _round_up((e_pad_min + 1) // 2, 128)
    return tile


def _edge_update_kernel(idx_ref, ea_ref, xs_ref, xt_ref, xu_ref,
                        w1_ref, b1_ref, w2_ref, b2_ref, gamma_ref, o_ref):
    """One tile of edges: fused gather + concat + MLP + RMSNorm."""
    te = ea_ref.shape[0]
    ns = xs_ref.shape[0]
    nt = xt_ref.shape[0]

    # ---- fused gather: one-hot(indices) @ node_table (exact in f32) -------
    src = idx_ref[:, 0:1]                                   # (TE, 1) int32
    tgt = idx_ref[:, 1:2]                                   # (TE, 1) int32
    src_oh = (src == jax.lax.broadcasted_iota(jnp.int32, (te, ns), 1)
              ).astype(jnp.float32)                          # (TE, Ns)
    tgt_oh = (tgt == jax.lax.broadcasted_iota(jnp.int32, (te, nt), 1)
              ).astype(jnp.float32)                          # (TE, Nt)
    xs_g = jnp.dot(src_oh, xs_ref[...].astype(jnp.float32),
                   preferred_element_type=jnp.float32)       # (TE, d_s)
    xt_g = jnp.dot(tgt_oh, xt_ref[...].astype(jnp.float32),
                   preferred_element_type=jnp.float32)       # (TE, d_t)

    xu = jnp.broadcast_to(xu_ref[...].astype(jnp.float32),
                          (te, xu_ref.shape[-1]))            # (TE, d_g)
    # Concatenate on the lane axis -> full K=message_dim for one MXU matmul.
    h = jnp.concatenate(
        [xs_g, xt_g, ea_ref[...].astype(jnp.float32), xu], axis=-1)  # (TE, M)

    # ---- Linear -> LeakyReLU -> Linear (MXU in weight dtype, f32 accum) ---
    z1 = jnp.dot(h.astype(w1_ref.dtype), w1_ref[...],
                 preferred_element_type=jnp.float32) + b1_ref[...]
    a = jnp.where(z1 >= 0, z1, LEAKY_SLOPE * z1)
    z2 = jnp.dot(a.astype(w2_ref.dtype), w2_ref[...],
                 preferred_element_type=jnp.float32) + b2_ref[...]

    # ---- RMSNorm over the feature axis with learnable scale gamma ---------
    ms = jnp.mean(z2 * z2, axis=-1, keepdims=True)
    inv = jax.lax.rsqrt(ms + RMS_EPS)
    o_ref[...] = (z2 * inv * gamma_ref[...]).astype(o_ref.dtype)


@functools.partial(jax.jit, static_argnames=("tile_e", "matmul_dtype"))
def message_passing_edge_model(x_s, x_t, edge_index, edge_attr, x_u, params,
                               tile_e=512, matmul_dtype=jnp.bfloat16):
    """JAX wrapper reproducing MessagePassingEdgeModel.forward."""
    w1, b1, w2, b2, gamma = (params["w1"], params["b1"], params["w2"],
                             params["b2"], params["gamma"])
    E = edge_attr.shape[0]
    d_s, d_t, d_e = x_s.shape[-1], x_t.shape[-1], edge_attr.shape[-1]
    d_g = x_u.shape[-1]
    M = d_s + d_t + d_e + d_g
    D = w2.shape[-1]
    assert w1.shape == (M, M) and w2.shape == (M, D)

    tile = _choose_tile(E, tile_e)
    E_pad = _round_up(E, tile)

    # Edge endpoints packed as (E, 2) int32 so the kernel can gather in-place.
    idx = jnp.transpose(edge_index.astype(jnp.int32))        # (E, 2)
    ea = edge_attr
    if E_pad != E:
        idx = jnp.pad(idx, ((0, E_pad - E), (0, 0)))          # pad -> node 0
        ea = jnp.pad(ea, ((0, E_pad - E), (0, 0)))

    # Pad node tables to a sublane multiple; one-hot never selects pad rows.
    ns_pad = _round_up(x_s.shape[0], 8)
    nt_pad = _round_up(x_t.shape[0], 8)
    x_s_p = jnp.pad(x_s, ((0, ns_pad - x_s.shape[0]), (0, 0)))
    x_t_p = jnp.pad(x_t, ((0, nt_pad - x_t.shape[0]), (0, 0)))
    x_u2 = x_u.reshape(1, d_g)

    # bf16 MXU inputs by default (f32 accumulation); f32 path kept for checks.
    w1m = w1.astype(matmul_dtype)
    w2m = w2.astype(matmul_dtype)

    # NOTE: x_s/x_t/weights/biases/gamma are grid-invariant.  Even with the
    # default double-buffering they cost < 0.3 MiB of VMEM at these dims, so
    # we skip pipeline_mode=pl.Buffered(1); revisit if message_dim grows.
    out = pl.pallas_call(
        _edge_update_kernel,
        out_shape=jax.ShapeDtypeStruct((E_pad, D), edge_attr.dtype),
        grid_spec=pltpu.PrefetchScalarGridSpec(
            num_scalar_prefetch=0,
            grid=(E_pad // tile,),
            in_specs=[
                pl.BlockSpec((tile, 2), lambda i: (i, 0)),       # (src,tgt) ids
                pl.BlockSpec((tile, d_e), lambda i: (i, 0)),     # edge_attr tile
                pl.BlockSpec((ns_pad, d_s), lambda i: (0, 0)),   # x_s (full)
                pl.BlockSpec((nt_pad, d_t), lambda i: (0, 0)),   # x_t (full)
                pl.BlockSpec((1, d_g), lambda i: (0, 0)),        # x_u
                pl.BlockSpec((M, M), lambda i: (0, 0)),          # W1
                pl.BlockSpec((1, M), lambda i: (0, 0)),          # b1
                pl.BlockSpec((M, D), lambda i: (0, 0)),          # W2
                pl.BlockSpec((1, D), lambda i: (0, 0)),          # b2
                pl.BlockSpec((1, D), lambda i: (0, 0)),          # RMSNorm gamma
            ],
            out_specs=pl.BlockSpec((tile, D), lambda i: (i, 0)),
        ),
        compiler_params=pltpu.CompilerParams(
            dimension_semantics=("parallel",),
            vmem_limit_bytes=32 * 1024 * 1024,
        ),
    )(idx, ea, x_s_p, x_t_p, x_u2, w1m, b1, w2m, b2, gamma)

    return out[:E]


def init_params(key, message_dim, lifted_edge_dim, dtype=jnp.float32):
    """Deterministic PyTorch-Linear-style init (uniform +/- 1/sqrt(fan_in))."""
    k1, k2, k3, k4 = jax.random.split(key, 4)
    lim1 = 1.0 / jnp.sqrt(message_dim)
    w1 = jax.random.uniform(k1, (message_dim, message_dim), dtype, -lim1, lim1)
    b1 = jax.random.uniform(k2, (1, message_dim), dtype, -lim1, lim1)
    w2 = jax.random.uniform(k3, (message_dim, lifted_edge_dim), dtype, -lim1, lim1)
    b2 = jax.random.uniform(k4, (1, lifted_edge_dim), dtype, -lim1, lim1)
    gamma = jnp.ones((1, lifted_edge_dim), dtype)   # RMSNorm weight init = ones
    return {"w1": w1, "b1": b1, "w2": w2, "b2": b2, "gamma": gamma}


def reference(x_s, x_t, edge_index, edge_attr, x_u, params):
    """Pure-JAX reference of the same forward pass (for sanity checking)."""
    src, tgt = edge_index[0], edge_index[1]
    E = edge_attr.shape[0]
    g = jnp.broadcast_to(x_u.reshape(1, -1), (E, x_u.shape[-1]))
    h = jnp.concatenate([x_s[src], x_t[tgt], edge_attr, g], axis=-1)
    z1 = h @ params["w1"] + params["b1"]
    a = jnp.where(z1 >= 0, z1, LEAKY_SLOPE * z1)
    z2 = a @ params["w2"] + params["b2"]
    inv = jax.lax.rsqrt(jnp.mean(z2 * z2, axis=-1, keepdims=True) + RMS_EPS)
    return z2 * inv * params["gamma"]


if __name__ == "__main__":
    # Small, deterministic shapes.
    lifted_src_dim, lifted_tgt_dim, lifted_edge_dim, global_dim = 32, 32, 32, 32
    message_dim = lifted_src_dim + lifted_tgt_dim + lifted_edge_dim + global_dim
    num_src_nodes, num_tgt_nodes, num_edges = 24, 20, 256

    key = jax.random.PRNGKey(0)
    k_xs, k_xt, k_ei, k_ea, k_xu, k_p = jax.random.split(key, 6)

    x_s = jax.random.normal(k_xs, (num_src_nodes, lifted_src_dim), jnp.float32)
    x_t = jax.random.normal(k_xt, (num_tgt_nodes, lifted_tgt_dim), jnp.float32)
    src = jax.random.randint(k_ei, (num_edges,), 0, num_src_nodes)
    tgt = jax.random.randint(jax.random.fold_in(k_ei, 1), (num_edges,), 0, num_tgt_nodes)
    edge_index = jnp.stack([src, tgt], axis=0)
    edge_attr = jax.random.normal(k_ea, (num_edges, lifted_edge_dim), jnp.float32)
    x_u = jax.random.normal(k_xu, (global_dim,), jnp.float32)

    params = init_params(k_p, message_dim, lifted_edge_dim)
    ref = reference(x_s, x_t, edge_index, edge_attr, x_u, params)

    # Exact-math path (f32 MXU inputs): must match the reference tightly.
    out_f32 = message_passing_edge_model(x_s, x_t, edge_index, edge_attr, x_u,
                                         params, matmul_dtype=jnp.float32)
    out_f32 = jax.block_until_ready(out_f32)
    assert out_f32.shape == (num_edges, lifted_edge_dim)
    assert jnp.allclose(out_f32, ref, atol=1e-5, rtol=1e-5)

    # Default fast path (bf16 MXU inputs, f32 accum/elementwise): looser check.
    out = message_passing_edge_model(x_s, x_t, edge_index, edge_attr, x_u, params)
    out = jax.block_until_ready(out)
    assert out.shape == (num_edges, lifted_edge_dim)
    assert jnp.allclose(out, ref, atol=5e-2, rtol=5e-2)

    print("KERNEL_OK")
</pallas_src>

<mosaic_0001>
module attributes {stable_mosaic.version = 11 : i64} {
  func.func @_edge_update_kernel(%arg0: i32, %arg1: memref<128x2xi32, #tpu.memory_space<vmem>>, %arg2: memref<128x32xf32, #tpu.memory_space<vmem>>, %arg3: memref<24x32xf32, #tpu.memory_space<vmem>>, %arg4: memref<24x32xf32, #tpu.memory_space<vmem>>, %arg5: memref<1x32xf32, #tpu.memory_space<vmem>>, %arg6: memref<128x128xf32, #tpu.memory_space<vmem>>, %arg7: memref<1x128xf32, #tpu.memory_space<vmem>>, %arg8: memref<128x32xf32, #tpu.memory_space<vmem>>, %arg9: memref<1x32xf32, #tpu.memory_space<vmem>>, %arg10: memref<1x32xf32, #tpu.memory_space<vmem>>, %arg11: memref<128x32xf32, #tpu.memory_space<vmem>>) attributes {dimension_semantics = [#tpu.dimension_semantics<parallel>], iteration_bounds = array<i64: 2>, scalar_prefetch = 0 : i64, scratch_operands = 0 : i64, tpu.core_type = #tpu.core_type<tc>, window_params = [{transform_indices = @transform_0, window_bounds = array<i64: 128, 2>}, {transform_indices = @transform_1, window_bounds = array<i64: 128, 32>}, {pipeline_mode = #tpu.pipeline_mode<synchronous>, transform_indices = @transform_2, window_bounds = array<i64: 24, 32>}, {pipeline_mode = #tpu.pipeline_mode<synchronous>, transform_indices = @transform_3, window_bounds = array<i64: 24, 32>}, {pipeline_mode = #tpu.pipeline_mode<synchronous>, transform_indices = @transform_4, window_bounds = array<i64: 1, 32>}, {pipeline_mode = #tpu.pipeline_mode<synchronous>, transform_indices = @transform_5, window_bounds = array<i64: 128, 128>}, {pipeline_mode = #tpu.pipeline_mode<synchronous>, transform_indices = @transform_6, window_bounds = array<i64: 1, 128>}, {pipeline_mode = #tpu.pipeline_mode<synchronous>, transform_indices = @transform_7, window_bounds = array<i64: 128, 32>}, {pipeline_mode = #tpu.pipeline_mode<synchronous>, transform_indices = @transform_8, window_bounds = array<i64: 1, 32>}, {pipeline_mode = #tpu.pipeline_mode<synchronous>, transform_indices = @transform_9, window_bounds = array<i64: 1, 32>}, {transform_indices = @transform_10, window_bounds = array<i64: 128, 32>}]} {
    %c0 = arith.constant 0 : index
    %c0_0 = arith.constant 0 : index
    %0 = vector.load %arg1[%c0, %c0_0] : memref<128x2xi32, #tpu.memory_space<vmem>>, vector<128x1xi32>
    %c0_1 = arith.constant 0 : index
    %c1 = arith.constant 1 : index
    %1 = vector.load %arg1[%c0_1, %c1] : memref<128x2xi32, #tpu.memory_space<vmem>>, vector<128x1xi32>
    %2 = tpu.iota {dimensions = array<i32: 1>} : vector<128x24xi32>
    %3 = vector.broadcast %0 : vector<128x1xi32> to vector<128x24xi32>
    %4 = arith.cmpi eq, %3, %2 : vector<128x24xi32>
    %5 = arith.extui %4 : vector<128x24xi1> to vector<128x24xi32>
    %6 = arith.sitofp %5 : vector<128x24xi32> to vector<128x24xf32>
    %7 = tpu.iota {dimensions = array<i32: 1>} : vector<128x24xi32>
    %8 = vector.broadcast %1 : vector<128x1xi32> to vector<128x24xi32>
    %9 = arith.cmpi eq, %8, %7 : vector<128x24xi32>
    %10 = arith.extui %9 : vector<128x24xi1> to vector<128x24xi32>
    %11 = arith.sitofp %10 : vector<128x24xi32> to vector<128x24xf32>
    %c0_2 = arith.constant 0 : index
    %c0_3 = arith.constant 0 : index
    %12 = vector.load %arg3[%c0_2, %c0_3] : memref<24x32xf32, #tpu.memory_space<vmem>>, vector<24x32xf32>
    %cst = arith.constant dense<0.000000e+00> : vector<128x32xf32>
    %13 = tpu.matmul %6, %12, %cst {dimension_numbers = #tpu.dot_dimension_numbers<[1], [0], [0], [1], [0, 0, 1, 1], [], []>} : vector<128x24xf32>, vector<24x32xf32>, vector<128x32xf32> -> vector<128x32xf32>
    %c0_4 = arith.constant 0 : index
    %c0_5 = arith.constant 0 : index
    %14 = vector.load %arg4[%c0_4, %c0_5] : memref<24x32xf32, #tpu.memory_space<vmem>>, vector<24x32xf32>
    %cst_6 = arith.constant dense<0.000000e+00> : vector<128x32xf32>
    %15 = tpu.matmul %11, %14, %cst_6 {dimension_numbers = #tpu.dot_dimension_numbers<[1], [0], [0], [1], [0, 0, 1, 1], [], []>} : vector<128x24xf32>, vector<24x32xf32>, vector<128x32xf32> -> vector<128x32xf32>
    %c0_7 = arith.constant 0 : index
    %c0_8 = arith.constant 0 : index
    %16 = vector.load %arg5[%c0_7, %c0_8] : memref<1x32xf32, #tpu.memory_space<vmem>>, vector<1x32xf32>
    %17 = vector.shape_cast %16 : vector<1x32xf32> to vector<1x32xf32>
    %18 = vector.broadcast %17 : vector<1x32xf32> to vector<128x32xf32>
    %c0_9 = arith.constant 0 : index
    %c0_10 = arith.constant 0 : index
    %19 = vector.load %arg2[%c0_9, %c0_10] : memref<128x32xf32, #tpu.memory_space<vmem>>, vector<128x32xf32>
    %20 = tpu.concatenate %13, %15, %19, %18 in 1 : vector<128x32xf32>, vector<128x32xf32>, vector<128x32xf32>, vector<128x32xf32> -> vector<128x128xf32>
    %c0_11 = arith.constant 0 : index
    %c0_12 = arith.constant 0 : index
    %21 = vector.load %arg6[%c0_11, %c0_12] : memref<128x128xf32, #tpu.memory_space<vmem>>, vector<128x128xf32>
    %cst_13 = arith.constant dense<0.000000e+00> : vector<128x128xf32>
    %22 = tpu.matmul %20, %21, %cst_13 {dimension_numbers = #tpu.dot_dimension_numbers<[1], [0], [0], [1], [0, 0, 1, 1], [], []>} : vector<128x128xf32>, vector<128x128xf32>, vector<128x128xf32> -> vector<128x128xf32>
    %c0_14 = arith.constant 0 : index
    %c0_15 = arith.constant 0 : index
    %23 = vector.load %arg7[%c0_14, %c0_15] : memref<1x128xf32, #tpu.memory_space<vmem>>, vector<1x128xf32>
    %24 = vector.broadcast %23 : vector<1x128xf32> to vector<128x128xf32>
    %25 = arith.addf %22, %24 : vector<128x128xf32>
    %cst_16 = arith.constant 0.000000e+00 : f32
    %26 = vector.broadcast %cst_16 : f32 to vector<128x128xf32>
    %27 = arith.cmpf oge, %25, %26 : vector<128x128xf32>
    %cst_17 = arith.constant 0.00999999977 : f32
    %28 = vector.broadcast %cst_17 : f32 to vector<128x128xf32>
    %29 = arith.mulf %28, %25 : vector<128x128xf32>
    %30 = arith.select %27, %25, %29 : vector<128x128xi1>, vector<128x128xf32>
    %c0_18 = arith.constant 0 : index
    %c0_19 = arith.constant 0 : index
    %31 = vector.load %arg8[%c0_18, %c0_19] : memref<128x32xf32, #tpu.memory_space<vmem>>, vector<128x32xf32>
    %cst_20 = arith.constant dense<0.000000e+00> : vector<128x32xf32>
    %32 = tpu.matmul %30, %31, %cst_20 {dimension_numbers = #tpu.dot_dimension_numbers<[1], [0], [0], [1], [0, 0, 1, 1], [], []>} : vector<128x128xf32>, vector<128x32xf32>, vector<128x32xf32> -> vector<128x32xf32>
    %c0_21 = arith.constant 0 : index
    %c0_22 = arith.constant 0 : index
    %33 = vector.load %arg9[%c0_21, %c0_22] : memref<1x32xf32, #tpu.memory_space<vmem>>, vector<1x32xf32>
    %34 = vector.broadcast %33 : vector<1x32xf32> to vector<128x32xf32>
    %35 = arith.addf %32, %34 : vector<128x32xf32>
    %36 = arith.mulf %35, %35 : vector<128x32xf32>
    %cst_23 = arith.constant dense<0.000000e+00> : vector<128xf32>
    %37 = vector.multi_reduction <add>, %36, %cst_23 [1] : vector<128x32xf32> to vector<128xf32>
    %38 = vector.shape_cast %37 : vector<128xf32> to vector<128x1xf32>
    %cst_24 = arith.constant 3.200000e+01 : f32
    %39 = vector.broadcast %cst_24 : f32 to vector<128x1xf32>
    %40 = arith.divf %38, %39 : vector<128x1xf32>
    %cst_25 = arith.constant 1.1920929E-7 : f32
    %41 = vector.broadcast %cst_25 : f32 to vector<128x1xf32>
    %42 = arith.addf %40, %41 : vector<128x1xf32>
    %43 = math.rsqrt %42 : vector<128x1xf32>
    %44 = vector.broadcast %43 : vector<128x1xf32> to vector<128x32xf32>
    %45 = arith.mulf %35, %44 : vector<128x32xf32>
    %c0_26 = arith.constant 0 : index
    %c0_27 = arith.constant 0 : index
    %46 = vector.load %arg10[%c0_26, %c0_27] : memref<1x32xf32, #tpu.memory_space<vmem>>, vector<1x32xf32>
    %47 = vector.broadcast %46 : vector<1x32xf32> to vector<128x32xf32>
    %48 = arith.mulf %45, %47 : vector<128x32xf32>
    %c0_28 = arith.constant 0 : index
    %c0_29 = arith.constant 0 : index
    %49 = vector.load %arg11[%c0_28, %c0_29] : memref<128x32xf32, #tpu.memory_space<vmem>>, vector<128x32xf32>
    tpu.vector_store %arg11[%c0_28, %c0_29], %48 {strides = array<i32>} : memref<128x32xf32, #tpu.memory_space<vmem>>, vector<128x32xf32>,
    return
  }
  func.func @transform_0(%arg0: i32) -> (i32, i32) {
    %c0_i32 = arith.constant 0 : i32
    %c0_i32_0 = arith.constant 0 : i32
    return %arg0, %c0_i32 : i32, i32
  }
  func.func @transform_1(%arg0: i32) -> (i32, i32) {
    %c0_i32 = arith.constant 0 : i32
    %c0_i32_0 = arith.constant 0 : i32
    return %arg0, %c0_i32 : i32, i32
  }
  func.func @transform_2(%arg0: i32) -> (i32, i32) {
    %c0_i32 = arith.constant 0 : i32
    %c0_i32_0 = arith.constant 0 : i32
    %c0_i32_1 = arith.constant 0 : i32
    return %c0_i32, %c0_i32_0 : i32, i32
  }
  func.func @transform_3(%arg0: i32) -> (i32, i32) {
    %c0_i32 = arith.constant 0 : i32
    %c0_i32_0 = arith.constant 0 : i32
    %c0_i32_1 = arith.constant 0 : i32
    return %c0_i32, %c0_i32_0 : i32, i32
  }
  func.func @transform_4(%arg0: i32) -> (i32, i32) {
    %c0_i32 = arith.constant 0 : i32
    %c0_i32_0 = arith.constant 0 : i32
    %c0_i32_1 = arith.constant 0 : i32
    return %c0_i32, %c0_i32_0 : i32, i32
  }
  func.func @transform_5(%arg0: i32) -> (i32, i32) {
    %c0_i32 = arith.constant 0 : i32
    %c0_i32_0 = arith.constant 0 : i32
    %c0_i32_1 = arith.constant 0 : i32
    return %c0_i32, %c0_i32_0 : i32, i32
  }
  func.func @transform_6(%arg0: i32) -> (i32, i32) {
    %c0_i32 = arith.constant 0 : i32
    %c0_i32_0 = arith.constant 0 : i32
    %c0_i32_1 = arith.constant 0 : i32
    return %c0_i32, %c0_i32_0 : i32, i32
  }
  func.func @transform_7(%arg0: i32) -> (i32, i32) {
    %c0_i32 = arith.constant 0 : i32
    %c0_i32_0 = arith.constant 0 : i32
    %c0_i32_1 = arith.constant 0 : i32
    return %c0_i32, %c0_i32_0 : i32, i32
  }
  func.func @transform_8(%arg0: i32) -> (i32, i32) {
    %c0_i32 = arith.constant 0 : i32
    %c0_i32_0 = arith.constant 0 : i32
    %c0_i32_1 = arith.constant 0 : i32
    return %c0_i32, %c0_i32_0 : i32, i32
  }
  func.func @transform_9(%arg0: i32) -> (i32, i32) {
    %c0_i32 = arith.constant 0 : i32
    %c0_i32_0 = arith.constant 0 : i32
    %c0_i32_1 = arith.constant 0 : i32
    return %c0_i32, %c0_i32_0 : i32, i32
  }
  func.func @transform_10(%arg0: i32) -> (i32, i32) {
    %c0_i32 = arith.constant 0 : i32
    %c0_i32_0 = arith.constant 0 : i32
    return %arg0, %c0_i32 : i32, i32
  }
}

</mosaic_0001>

<bundles_post_ra>
// kernel: message_passing_edge_model.1
= control target key start
LH: loop header
LB: loop body
LE: loop exit
PB: predicated region body
PF: predicated region fallthrough
CT: control target
= control target key end

     0   :  { %s1883_s13 = smov 0   ;;  %s2495_s0 = inlined_call_operand.vmem [shape: s32[256,2], index: 0, kind: input, shape index: {}]   ;;  %s2496_s1 = inlined_call_operand.vmem [shape: f32[256,32], index: 1, kind: input, shape index: {}]   ;;  %s2497_s2 = inlined_call_operand.vmem [shape: f32[24,32], index: 2, kind: input, shape index: {}]   ;;  %s2498_s3 = inlined_call_operand.vmem [shape: f32[24,32], index: 3, kind: input, shape index: {}]   ;;  %s2499_s4 = inlined_call_operand.vmem [shape: f32[1,32], index: 4, kind: input, shape index: {}]   ;;  %s2500_s5 = inlined_call_operand.vmem [shape: f32[128,128], index: 5, kind: input, shape index: {}]   ;;  %s2501_s6 = inlined_call_operand.vmem [shape: f32[1,128], index: 6, kind: input, shape index: {}]   ;;  %s2502_s7 = inlined_call_operand.vmem [shape: f32[128,32], index: 7, kind: input, shape index: {}]   ;;  %s2503_s8 = inlined_call_operand.vmem [shape: f32[1,32], index: 8, kind: input, shape index: {}]   ;;  %s2504_s9 = inlined_call_operand.vmem [shape: f32[1,32], index: 9, kind: input, shape index: {}]   ;;  %s2505_s10 = inlined_call_operand.vmem [shape: f32[256,32], index: 10, kind: output, shape index: {}]  }
   0x1 LB: > { %s1630_s14 = sadd.s32 4294967295, %s1819_s13   ;;  %p1634_p0 = scmp.ge.s32.totalorder %s1819_s13, 1  ;;  %s1819_s13 = sphi %s1883_s13, %s20_s13  }
   0x2   : > { %p324_p1 = scmp.lt.s32.totalorder %s1819_s13, 3 }
   0x4   : > { %p325_p2 = pnand %p1634_p0, %p324_p1 }
   0x5   : > { %s1635_s15 = sshll.u32 (!%p325_p2), %s1630_s14, 4  ;;  %s1825_s20 = smov (!%p325_p2), 64  }
   0x6   : > { %328 = sbr.rel (%p325_p2) target bundleno = 940 (0x3ac), region = 60  ;;  %p368_p3 = scmp.lt.s32.totalorder (!%p325_p2), %s1635_s15, 31 }
   0x7   : > { %s1826_s21 = smov (!%p325_p2), 32  }
   0xb   : > { %v1821_v0 = vmov 1   ;;  %s2507_s15 = smov (!%p368_p3, %s1635_s15), 31  ;;  %v1822_v6 = vmov 0   ;;  %v714_v12 = vld [vmem:[%s2498_s3 + $0x10] sm:$0xff]  ;;  %v713_v13 = vld [vmem:[%s2498_s3 + $0x8] sm:$0xff]  ;;  %v712_v19 = vld [vmem:[%s2498_s3] sm:$0xff]  ;;  %v401_v21 = vlaneseq }
   0xc   : > { %1754 = vset.pattern.permute.xlu0 %v1821_v0  ;;  %1755 = vset.pattern.permute.xlu1 %v1821_v0  ;;  %s1894_s16 = sshll.u32 %s2507_s15, 3  ;;  %v597_v23 = vld [vmem:[%s2497_s2 + $0x10] sm:$0xff]  ;;  %v596_v25 = vld [vmem:[%s2497_s2 + $0x8] sm:$0xff]  ;;  %v595_v27 = vld [vmem:[%s2497_s2] sm:$0xff]  ;;  %v1823_v28 = vmov 0.0   ;;  %vm598_vm1 = vcmask 195584  }
   0xd   : > { %1756 = vset.pattern.permute.xlu2 %v1821_v0  ;;  %s1900_s19 = scalar_lea.vmem %s2495_s0, %s1894_s16  ;;  %776 = vmatpush.msra.mxu1 %v714_v12  ;;  %v1943_v22 = vand.u32 127, %v401_v21  ;;  %s1824_s15 = smov 96  }
   0xe   : > { %v385_v1 = vld [vmem:[%s1900_s19] sm:$0xff]  ;;  %v387_v2 = vld [vmem:[%s1900_s19 + $0x10] sm:$0xff]  ;;  %v386_v4 = vld [vmem:[%s1900_s19 + $0x8] sm:$0xff]  ;;  %660 = vmatpush.msra.mxu0 %v597_v23  ;;  %s2414_s25 = scalar_lea.vmem %s2505_s10, %s1894_s16 }
   0xf   : > { %500 = vperm.xlu0 %1754, %v385_v1   ;;  %506 = vperm.xlu1 %1755, %v387_v2   ;;  %v389_v3 = vld [vmem:[%s1900_s19 + $0x20] sm:$0xff]  ;;  %v388_v5 = vld [vmem:[%s1900_s19 + $0x18] sm:$0xff]  ;;  %v390_v7 = vld [vmem:[%s1900_s19 + $0x28] sm:$0xff] }
  0x10   : > { %512 = vperm.xlu2 %1756, %v389_v3   ;;  %v391_v8 = vld [vmem:[%s1900_s19 + $0x30] sm:$0xff]  ;;  %v392_v9 = vld [vmem:[%s1900_s19 + $0x38] sm:$0xff]  ;;  %v393_v10 = vld [vmem:[%s1900_s19 + $0x40] sm:$0xff]  ;;  %777 = vmatpush.msra.mxu1 %v713_v13 }
  0x11   : > { %v394_v11 = vld [vmem:[%s1900_s19 + $0x48] sm:$0xff]  ;;  %v395_v14 = vld [vmem:[%s1900_s19 + $0x50] sm:$0xff]  ;;  %v396_v16 = vld [vmem:[%s1900_s19 + $0x58] sm:$0xff]  ;;  %661 = vmatpush.msra.mxu0 %v596_v25 }
  0x12   : > { %v399_v15 = vld [vmem:[%s1900_s19 + $0x70] sm:$0xff]  ;;  %v397_v17 = vld [vmem:[%s1900_s19 + $0x60] sm:$0xff]  ;;  %v398_v18 = vld [vmem:[%s1900_s19 + $0x68] sm:$0xff]  ;;  %778 = vmatpush.msra.mxu1 %v712_v19 }
  0x13   : > { %v400_v24 = vld [vmem:[%s1900_s19 + $0x78] sm:$0xff]  ;;  %662 = vmatpush.msra.mxu0 %v595_v27  ;;  %s2036_s19 = scalar_lea.vmem %s2496_s1, %s1894_s16 }
  0x17   : > { %503 = vperm.xlu0 %1754, %v386_v4   ;;  %509 = vperm.xlu1 %1755, %v388_v5  }
  0x18   : > { %1757 = vset.pattern.permute.xlu2 %v1822_v6 }
  0x19   : > { %404 = vperm.xlu2 %1757, %v385_v1  }
  0x1f   : > { %515 = vperm.xlu0 %1754, %v390_v7   ;;  %1758 = vset.pattern.permute.xlu1 %v1822_v6 }
  0x20   : > { %407 = vperm.xlu1 %1758, %v386_v4  }
  0x21   : > { %1759 = vset.pattern.permute.xlu2 %v1821_v0 }
  0x22   : > { %518 = vperm.xlu2 %1759, %v391_v8  }
  0x27   : > { %1760 = vset.pattern.permute.xlu0 %v1822_v6 }
  0x28   : > { %1761 = vset.pattern.permute.xlu1 %v1821_v0  ;;  %410 = vperm.xlu0 %1760, %v387_v2  }
  0x29   : > { %521 = vperm.xlu1 %1761, %v392_v9  }
  0x2a   : > { %1762 = vset.pattern.permute.xlu2 %v1822_v6 }
  0x2b   : > { %413 = vperm.xlu2 %1762, %v388_v5  }
  0x30   : > { %1763 = vset.pattern.permute.xlu0 %v1821_v0 }
  0x31   : > { %524 = vperm.xlu1 %1761, %v393_v10   ;;  %527 = vperm.xlu0 %1763, %v394_v11  }
  0x33   : > { %416 = vperm.xlu2 %1762, %v389_v3  }
  0x39   : > { %1764 = vset.pattern.permute.xlu1 %v1822_v6  ;;  %1766 = vset.pattern.permute.xlu0 %v1822_v6 }
  0x3a   : > { %419 = vperm.xlu1 %1764, %v390_v7   ;;  %425 = vperm.xlu0 %1766, %v392_v9  }
  0x3b   : > { %1765 = vset.pattern.permute.xlu2 %v1821_v0 }
  0x3c   : > { %530 = vperm.xlu2 %1765, %v395_v14  }
  0x42   : > { %422 = vperm.xlu1 %1764, %v391_v8   ;;  %1769 = vset.pattern.permute.xlu0 %v1821_v0 }
  0x43   : > { %542 = vperm.xlu0 %1769, %v399_v15  }
  0x44   : > { %533 = vperm.xlu2 %1765, %v396_v16  }
  0x4a   : > { %1767 = vset.pattern.permute.xlu1 %v1821_v0 }
  0x4b   : > { %536 = vperm.xlu1 %1767, %v397_v17   ;;  %1773 = vset.pattern.permute.xlu0 %v1822_v6 }
  0x4c   : > { %1768 = vset.pattern.permute.xlu2 %v1822_v6  ;;  %443 = vperm.xlu0 %1773, %v398_v18  }
  0x4d   : > { %428 = vperm.xlu2 %1768, %v393_v10   ;;  %v1775_v10 = vld [vmem:[%s2499_s4] ss:$0 sm:$0xff] }
  0x53   : > { %539 = vperm.xlu1 %1767, %v398_v18  }
  0x54   : > { %1774 = vset.pattern.permute.xlu0 %v1821_v0 }
  0x55   : > { %431 = vperm.xlu2 %1768, %v394_v11   ;;  %975 = vrot.lane.b32.xlu0 %v1775_v10, %s1824_s15  ;;  %v845_v10 = vld [vmem:[%s2036_s19 + $0x70] sm:$0xff] }
  0x5b   : > { %1770 = vset.pattern.permute.xlu1 %v1822_v6 }
  0x5c   : > { %434 = vperm.xlu1 %1770, %v395_v14   ;;  %v832_v14 = vld [vmem:[%s2036_s19 + $0x8] sm:$0xff] }
  0x5d   : > { %1771 = vset.pattern.permute.xlu2 %v1821_v0 }
  0x5e   : > { %545 = vperm.xlu2 %1771, %v400_v24  }
  0x64   : > { %437 = vperm.xlu1 %1770, %v396_v16  }
  0x66   : > { %1772 = vset.pattern.permute.xlu2 %v1822_v6 }
  0x67   : > { %440 = vperm.xlu2 %1772, %v397_v17   ;;  %v833_v17 = vld [vmem:[%s2036_s19 + $0x10] sm:$0xff] }
  0x6a   : > { %v513_v20 = vpop.permute.xlu2 %512 }
  0x6b   : > { %vm551_vm9 = vcmp.eq.s32.totalorder %v513_v20, %v1943_v22 }
  0x6c   : > { %446 = vperm.xlu1 %1770, %v399_v15   ;;  %v1661_v47 = vsel %vm551_vm9, 1.0, %v1823_v28 }
  0x6f   : > { %449 = vperm.xlu2 %1772, %v400_v24  }
  0x73   : > { %v405_v26 = vpop.permute.xlu2 %404 }
  0x74   : > { %vm451_vm0 = vcmp.eq.s32.totalorder %v405_v26, %v1943_v22  ;;  %v834_v26 = vld [vmem:[%s2036_s19 + $0x18] sm:$0xff] }
  0x75   : > { %v1641_v29 = vsel %vm451_vm0, 1.0, %v1823_v28 }
  0x76   : > { %1673 = vmatmul.msk.f32.vlgmr.msra.gmra.mxu0 %vm598_vm1, %v1641_v29 }
  0x77   : > { %929 = vrot.lane.b32.xlu2 %v832_v14, %s1825_s20 }
  0x7c   : > { %v519_v36 = vpop.permute.xlu2 %518 }
  0x7d   : > { %vm553_vm12 = vcmp.eq.s32.totalorder %v519_v36, %v1943_v22 }
  0x7e   : > { %v1663_v54 = vsel %vm553_vm12, 1.0, %v1823_v28 }
  0x7f   : > { %931 = vrot.lane.b32.xlu2 %v833_v17, %s1825_s20 }
  0x81   : > { %v501_v30 = vpop.permute.xlu0 %500  ;;  %v507_v31 = vpop.permute.xlu1 %506 }
  0x82   : > { %vm547_vm2 = vcmp.eq.s32.totalorder %v501_v30, %v1943_v22  ;;  %vm549_vm4 = vcmp.eq.s32.totalorder %v507_v31, %v1943_v22  ;;  %v835_v31 = vld [vmem:[%s2036_s19 + $0x20] sm:$0xff] }
  0x83   : > { %v1657_v32 = vsel %vm547_vm2, 1.0, %v1823_v28  ;;  %v1659_v37 = vsel %vm549_vm4, 1.0, %v1823_v28 }
  0x84   : > { %1689 = vmatmul.msk.f32.vlgmr.msra.gmra.mxu1 %vm598_vm1, %v1657_v32 }
  0x85   : > { %v414_v42 = vpop.permute.xlu2 %413 }
  0x86   : > { %vm454_vm8 = vcmp.eq.s32.totalorder %v414_v42, %v1943_v22 }
  0x87   : > { %v1644_v46 = vsel %vm454_vm8, 1.0, %v1823_v28 }
  0x89   : > { %v504_v33 = vpop.permute.xlu0 %503  ;;  %v510_v34 = vpop.permute.xlu1 %509 }
  0x8a   : > { %vm548_vm3 = vcmp.eq.s32.totalorder %v504_v33, %v1943_v22  ;;  %vm550_vm6 = vcmp.eq.s32.totalorder %v510_v34, %v1943_v22 }
  0x8b   : > { %v1658_v35 = vsel %vm548_vm3, 1.0, %v1823_v28  ;;  %v1660_v43 = vsel %vm550_vm6, 1.0, %v1823_v28 }
  0x8c   : > { %1690 = vmatmul.msk.f32.gmra.mxu1 %vm598_vm1, %v1658_v35  ;;  %v836_v35 = vld [vmem:[%s2036_s19 + $0x28] sm:$0xff] }
  0x8d   : > { %v417_v49 = vpop.permute.xlu2 %416 }
  0x8e   : > { %vm455_vm10 = vcmp.eq.s32.totalorder %v417_v49, %v1943_v22 }
  0x8f   : > { %v1645_v50 = vsel %vm455_vm10, 1.0, %v1823_v28 }
  0x91   : > { %v516_v38 = vpop.permute.xlu0 %515 }
  0x92   : > { %v408_v39 = vpop.permute.xlu1 %407  ;;  %vm552_vm11 = vcmp.eq.s32.totalorder %v516_v38, %v1943_v22 }
  0x93   : > { %vm452_vm5 = vcmp.eq.s32.totalorder %v408_v39, %v1943_v22  ;;  %v1662_v51 = vsel %vm552_vm11, 1.0, %v1823_v28  ;;  %v838_v39 = vld [vmem:[%s2036_s19 + $0x38] sm:$0xff] }
  0x94   : > { %1691 = vmatmul.msk.f32.gmra.mxu1 %vm598_vm1, %v1659_v37  ;;  %v1642_v40 = vsel %vm452_vm5, 1.0, %v1823_v28  ;;  %v837_v37 = vld [vmem:[%s2036_s19 + $0x30] sm:$0xff] }
  0x95   : > { %1674 = vmatmul.msk.f32.gmra.mxu0 %vm598_vm1, %v1642_v40 }
  0x96   : > { %v531_v53 = vpop.permute.xlu2 %530 }
  0x97   : > { %vm557_vm5 = vcmp.eq.s32.totalorder %v531_v53, %v1943_v22  ;;  %v1038_v53 = vld [vmem:[%s2500_s5 + $0x48] sm:$0xff] }
  0x98   : > { %v1667_v4 = vsel %vm557_vm5, 1.0, %v1823_v28 }
  0x9a   : > { %v411_v41 = vpop.permute.xlu0 %410 }
  0x9b   : > { %vm453_vm7 = vcmp.eq.s32.totalorder %v411_v41, %v1943_v22  ;;  %v522_v44 = vpop.permute.xlu1 %521 }
  0x9c   : > { %1692 = vmatmul.msk.f32.gmra.mxu1 %vm598_vm1, %v1660_v43  ;;  %v1643_v45 = vsel %vm453_vm7, 1.0, %v1823_v28  ;;  %vm554_vm14 = vcmp.eq.s32.totalorder %v522_v44, %v1943_v22  ;;  %v839_v43 = vld [vmem:[%s2036_s19 + $0x40] sm:$0xff]  ;;  %v1044_v44 = vld [vmem:[%s2500_s5 + $0x78] sm:$0xff] }
  0x9d   : > { %1675 = vmatmul.msk.f32.gmra.mxu0 %vm598_vm1, %v1643_v45  ;;  %v1664_v58 = vsel %vm554_vm14, 1.0, %v1823_v28  ;;  %1707 = vmatpush.msra.mxu2 %v1044_v44 }
  0x9e   : > { %v534_v60 = vpop.permute.xlu2 %533  ;;  %1049 = vmatpush.msrb.mxu0 %v1044_v44 }
  0x9f   : > { %vm558_vm7 = vcmp.eq.s32.totalorder %v534_v60, %v1943_v22  ;;  %v1033_v60 = vld [vmem:[%s2500_s5 + $0x20] sm:$0xff] }
  0xa0   : > { %v1668_v6 = vsel %vm558_vm7, 1.0, %v1823_v28 }
  0xa3   : > { %v525_v48 = vpop.permute.xlu1 %524  ;;  %v528_v56 = vpop.permute.xlu0 %527 }
  0xa4   : > { %1693 = vmatmul.msk.f32.gmra.mxu1 %vm598_vm1, %v1661_v47  ;;  %vm555_vm2 = vcmp.eq.s32.totalorder %v525_v48, %v1943_v22  ;;  %vm556_vm3 = vcmp.eq.s32.totalorder %v528_v56, %v1943_v22  ;;  %v1042_v48 = vld [vmem:[%s2500_s5 + $0x68] sm:$0xff]  ;;  %v1036_v56 = vld [vmem:[%s2500_s5 + $0x38] sm:$0xff] }
  0xa5   : > { %1676 = vmatmul.msk.f32.gmra.mxu0 %vm598_vm1, %v1644_v46  ;;  %v1665_v0 = vsel %vm555_vm2, 1.0, %v1823_v28  ;;  %v1666_v1 = vsel %vm556_vm3, 1.0, %v1823_v28  ;;  %v1043_v46 = vld [vmem:[%s2500_s5 + $0x70] sm:$0xff]  ;;  %vm995_vm3 = vcmask 523264  }
  0xa6   : > { %1708 = vmatpush.msra.mxu2 %v1043_v46  ;;  %1050 = vmatpush.msrb.mxu0 %v1043_v46 }
  0xa7   : > { %v429_v63 = vpop.permute.xlu2 %428 }
  0xa8   : > { %vm459_vm4 = vcmp.eq.s32.totalorder %v429_v63, %v1943_v22  ;;  %1709 = vmatpush.msra.mxu2 %v1042_v48  ;;  %1051 = vmatpush.msrb.mxu0 %v1042_v48 }
  0xa9   : > { %v1649_v2 = vsel %vm459_vm4, 1.0, %v1823_v28  ;;  %vm1012_vm4 = vcmask 785408  }
  0xac   : > { %1694 = vmatmul.msk.f32.gmra.mxu1 %vm598_vm1, %v1662_v51  ;;  %v420_v52 = vpop.permute.xlu1 %419  ;;  %v426_v61 = vpop.permute.xlu0 %425  ;;  %v840_v51 = vld [vmem:[%s2036_s19 + $0x48] sm:$0xff] }
  0xad   : > { %1677 = vmatmul.msk.f32.gmra.mxu0 %vm598_vm1, %v1645_v50  ;;  %vm456_vm13 = vcmp.eq.s32.totalorder %v420_v52, %v1943_v22  ;;  %vm458_vm0 = vcmp.eq.s32.totalorder %v426_v61, %v1943_v22  ;;  %v1041_v50 = vld [vmem:[%s2500_s5 + $0x60] sm:$0xff]  ;;  %v842_v61 = vld [vmem:[%s2036_s19 + $0x58] sm:$0xff] }
  0xae   : > { %v1646_v55 = vsel %vm456_vm13, 1.0, %v1823_v28  ;;  %v1648_v62 = vsel %vm458_vm0, 1.0, %v1823_v28  ;;  %1710 = vmatpush.msra.mxu2 %v1041_v50  ;;  %1052 = vmatpush.msrb.mxu0 %v1041_v50 }
  0xaf   : > { %v432_v3 = vpop.permute.xlu2 %431 }
  0xb0   : > { %vm460_vm6 = vcmp.eq.s32.totalorder %v432_v3, %v1943_v22  ;;  %v1029_v3 = vld [vmem:[%s2500_s5] sm:$0xff] }
  0xb1   : > { %v1650_v5 = vsel %vm460_vm6, 1.0, %v1823_v28 }
  0xb4   : > { %1695 = vmatmul.msk.f32.gmra.mxu1 %vm598_vm1, %v1663_v54  ;;  %v423_v57 = vpop.permute.xlu1 %422  ;;  %v1037_v54 = vld [vmem:[%s2500_s5 + $0x40] sm:$0xff] }
  0xb5   : > { %1678 = vmatmul.msk.f32.gmra.mxu0 %vm598_vm1, %v1646_v55  ;;  %vm457_vm15 = vcmp.eq.s32.totalorder %v423_v57, %v1943_v22  ;;  %v543_v12 = vpop.permute.xlu0 %542  ;;  %v841_v55 = vld [vmem:[%s2036_s19 + $0x50] sm:$0xff] }
  0xb6   : > { %v1647_v59 = vsel %vm457_vm15, 1.0, %v1823_v28  ;;  %vm561_vm10 = vcmp.eq.s32.totalorder %v543_v12, %v1943_v22 }
  0xb7   : > { %v1671_v13 = vsel %vm561_vm10, 1.0, %v1823_v28 }
  0xb8   : > { %v546_v15 = vpop.permute.xlu2 %545 }
  0xb9   : > { %vm562_vm11 = vcmp.eq.s32.totalorder %v546_v15, %v1943_v22 }
  0xba   : > { %v1672_v16 = vsel %vm562_vm11, 1.0, %v1823_v28 }
  0xbc   : > { %1696 = vmatmul.msk.f32.gmra.mxu1 %vm598_vm1, %v1664_v58  ;;  %v1035_v58 = vld [vmem:[%s2500_s5 + $0x30] sm:$0xff] }
  0xbd   : > { %1679 = vmatmul.msk.f32.gmra.mxu0 %vm598_vm1, %v1647_v59  ;;  %v537_v7 = vpop.permute.xlu1 %536  ;;  %v1034_v59 = vld [vmem:[%s2500_s5 + $0x28] sm:$0xff] }
  0xbe   : > { %vm559_vm8 = vcmp.eq.s32.totalorder %v537_v7, %v1943_v22  ;;  %v444_v33 = vpop.permute.xlu0 %443  ;;  %v844_v7 = vld [vmem:[%s2036_s19 + $0x68] sm:$0xff] }
  0xbf   : > { %v1669_v8 = vsel %vm559_vm8, 1.0, %v1823_v28  ;;  %vm464_vm15 = vcmp.eq.s32.totalorder %v444_v33, %v1943_v22 }
  0xc0   : > { %v1654_v34 = vsel %vm464_vm15, 1.0, %v1823_v28 }
  0xc1   : > { %v441_v29 = vpop.permute.xlu2 %440 }
  0xc2   : > { %vm463_vm14 = vcmp.eq.s32.totalorder %v441_v29, %v1943_v22 }
  0xc3   : > { %v1653_v30 = vsel %vm463_vm14, 1.0, %v1823_v28 }
  0xc4   : > { %1697 = vmatmul.msk.f32.gmra.mxu1 %vm598_vm1, %v1665_v0 }
  0xc5   : > { %1680 = vmatmul.msk.f32.gmra.mxu0 %vm598_vm1, %v1648_v62  ;;  %v540_v9 = vpop.permute.xlu1 %539  ;;  %v1032_v62 = vld [vmem:[%s2500_s5 + $0x18] sm:$0xff] }
  0xc6   : > { %vm560_vm9 = vcmp.eq.s32.totalorder %v540_v9, %v1943_v22 }
  0xc7   : > { %v1670_v11 = vsel %vm560_vm9, 1.0, %v1823_v28  ;;  %v2160_v17 = vpop.permute.xlu0 %975 }
  0xc9   : > { %v450_v47 = vpop.permute.xlu2 %449 }
  0xca   : > { %vm466_vm2 = vcmp.eq.s32.totalorder %v450_v47, %v1943_v22 }
  0xcb   : > { %v1656_v49 = vsel %vm466_vm2, 1.0, %v1823_v28 }
  0xcc   : > { %1698 = vmatmul.msk.f32.gmra.mxu1 %vm598_vm1, %v1666_v1  ;;  %v1031_v1 = vld [vmem:[%s2500_s5 + $0x10] sm:$0xff] }
  0xcd   : > { %1681 = vmatmul.msk.f32.gmra.mxu0 %vm598_vm1, %v1649_v2  ;;  %v1030_v2 = vld [vmem:[%s2500_s5 + $0x8] sm:$0xff] }
  0xce   : > { %v435_v20 = vpop.permute.xlu1 %434 }
  0xcf   : > { %vm461_vm12 = vcmp.eq.s32.totalorder %v435_v20, %v1943_v22 }
  0xd0   : > { %v1651_v21 = vsel %vm461_vm12, 1.0, %v1823_v28 }
  0xd1   : > { %v930_v15 = vpop.permute.xlu2 %929 }
  0xd4   : > { %1699 = vmatmul.msk.f32.gmra.mxu1 %vm598_vm1, %v1667_v4  ;;  %v843_v4 = vld [vmem:[%s2036_s19 + $0x60] sm:$0xff] }
  0xd5   : > { %1682 = vmatmul.msk.f32.gmra.mxu0 %vm598_vm1, %v1650_v5 }
  0xd6   : > { %v438_v24 = vpop.permute.xlu1 %437 }
  0xd7   : > { %vm462_vm13 = vcmp.eq.s32.totalorder %v438_v24, %v1943_v22 }
  0xd8   : > { %v1652_v25 = vsel %vm462_vm13, 1.0, %v1823_v28 }
  0xdc   : > { %1700 = vmatmul.msk.f32.gmra.mxu1 %vm598_vm1, %v1668_v6 }
  0xdd   : > { %1683 = vmatmul.msk.f32.gmra.mxu0 %vm598_vm1, %v1651_v21 }
  0xde   : > { %v447_v41 = vpop.permute.xlu1 %446 }
  0xdf   : > { %vm465_vm0 = vcmp.eq.s32.totalorder %v447_v41, %v1943_v22  ;;  %v1040_v22 = vld [vmem:[%s2500_s5 + $0x58] sm:$0xff] }
  0xe0   : > { %v1655_v42 = vsel %vm465_vm0, 1.0, %v1823_v28  ;;  %1711 = vmatpush.msra.mxu2 %v1040_v22  ;;  %v1039_v28 = vld [vmem:[%s2500_s5 + $0x50] sm:$0xff]  ;;  %1053 = vmatpush.msrb.mxu0 %v1040_v22 }
  0xe2   : > { %1712 = vmatpush.msra.mxu2 %v1039_v28  ;;  %1054 = vmatpush.msrb.mxu0 %v1039_v28 }
  0xe4   : > { %1701 = vmatmul.msk.f32.gmra.mxu1 %vm598_vm1, %v1669_v8  ;;  %1713 = vmatpush.msra.mxu2 %v1038_v53 }
  0xe5   : > { %1684 = vmatmul.msk.f32.gmra.mxu0 %vm598_vm1, %v1652_v25  ;;  %v932_v25 = vpop.permute.xlu2 %931 }
  0xe6   : > { %1714 = vmatpush.msra.mxu2 %v1037_v54  ;;  %1055 = vmatpush.msrb.mxu0 %v1038_v53 }
  0xe8   : > { %1715 = vmatpush.msra.mxu2 %v1036_v56  ;;  %1056 = vmatpush.msrb.mxu0 %v1037_v54 }
  0xea   : > { %1716 = vmatpush.msra.mxu2 %v1035_v58  ;;  %1057 = vmatpush.msrb.mxu0 %v1036_v56 }
  0xec   : > { %1702 = vmatmul.msk.f32.gmra.mxu1 %vm598_vm1, %v1670_v11  ;;  %1717 = vmatpush.msra.mxu2 %v1034_v59 }
  0xed   : > { %1685 = vmatmul.msk.f32.gmra.mxu0 %vm598_vm1, %v1653_v30 }
  0xee   : > { %1058 = vmatpush.msrb.mxu0 %v1035_v58  ;;  %1718 = vmatpush.msra.mxu2 %v1033_v60 }
  0xf0   : > { %1059 = vmatpush.msrb.mxu0 %v1034_v59  ;;  %1719 = vmatpush.msra.mxu2 %v1032_v62 }
  0xf2   : > { %1060 = vmatpush.msrb.mxu0 %v1033_v60  ;;  %1720 = vmatpush.msra.mxu2 %v1031_v1 }
  0xf3   : > { %v2133_v63 = vpop.f32.mrf.mxu0 }
  0xf4   : > { %1703 = vmatmul.msk.f32.gmra.mxu1 %vm598_vm1, %v1671_v13  ;;  %1061 = vmatpush.msrb.mxu0 %v1032_v62  ;;  %v846_v13 = vld [vmem:[%s2036_s19 + $0x78] sm:$0xff] }
  0xf5   : > { %1686 = vmatmul.msk.f32.gmra.mxu0 %vm598_vm1, %v1654_v34  ;;  %1721 = vmatpush.msra.mxu2 %v1030_v2 }
  0xf6   : > { %1062 = vmatpush.msrb.mxu0 %v1031_v1 }
  0xf7   : > { %1722 = vmatpush.msra.mxu2 %v1029_v3 }
  0xf8   : > { %1063 = vmatpush.msrb.mxu0 %v1030_v2 }
  0xfa   : > { %1064 = vmatpush.msrb.mxu0 %v1029_v3 }
  0xfc   : > { %1704 = vmatmul.msk.f32.gmra.mxu1 %vm598_vm1, %v1672_v16 }
  0xfd   : > { %1687 = vmatmul.msk.f32.gmra.mxu0 %vm598_vm1, %v1655_v42 }
 0x101   : > { %v2047_v18 = vpop.f32.mrf.mxu1 }
 0x105   : > { %1688 = vmatmul.msk.f32.gmra.mxu0 %vm598_vm1, %v1656_v49  ;;  %vm978_vm1 = vcmask 261120  }
 0x109   : > { %v783_v19 = vpop.f32.mrf.mxu1 }
 0x10a   : > { %865 = vrot.lane.b32.xlu1 %v783_v19, %s1826_s21 }
 0x111   : > { %v786_v23 = vpop.f32.mrf.mxu1 }
 0x112   : > { %867 = vrot.lane.b32.xlu1 %v786_v23, %s1826_s21  ;;  %v667_v6 = vpop.f32.mrf.mxu0  ;;  %v831_v23 = vld [vmem:[%s2036_s19] sm:$0xff] }
 0x119   : > { %v789_v27 = vpop.f32.mrf.mxu1 }
 0x11a   : > { %869 = vrot.lane.b32.xlu0 %v789_v27, %s1826_s21  ;;  %933 = vrot.lane.b32.xlu1 %v834_v26, %s1825_s20  ;;  %v670_v9 = vpop.f32.mrf.mxu0 }
 0x121   : > { %v792_v32 = vpop.f32.mrf.mxu1 }
 0x122   : > { %935 = vrot.lane.b32.xlu0 %v835_v31, %s1825_s20  ;;  %871 = vrot.lane.b32.xlu2 %v792_v32, %s1826_s21  ;;  %v673_v12 = vpop.f32.mrf.mxu0 }
 0x129   : > { %v795_v36 = vpop.f32.mrf.mxu1 }
 0x12a   : > { %873 = vrot.lane.b32.xlu1 %v795_v36, %s1826_s21  ;;  %937 = vrot.lane.b32.xlu2 %v836_v35, %s1825_s20 }
 0x131   : > { %v798_v38 = vpop.f32.mrf.mxu1 }
 0x132   : > { %875 = vrot.lane.b32.xlu0 %v798_v38, %s1826_s21  ;;  %939 = vrot.lane.b32.xlu1 %v837_v37, %s1825_s20 }
 0x139   : > { %v801_v40 = vpop.f32.mrf.mxu1 }
 0x13a   : > { %941 = vrot.lane.b32.xlu0 %v838_v39, %s1825_s20  ;;  %877 = vrot.lane.b32.xlu2 %v801_v40, %s1826_s21 }
 0x141   : > { %v804_v45 = vpop.f32.mrf.mxu1 }
 0x142   : > { %879 = vrot.lane.b32.xlu1 %v804_v45, %s1826_s21  ;;  %943 = vrot.lane.b32.xlu2 %v839_v43, %s1825_s20 }
 0x149   : > { %v807_v52 = vpop.f32.mrf.mxu1 }
 0x14a   : > { %881 = vrot.lane.b32.xlu0 %v807_v52, %s1826_s21  ;;  %945 = vrot.lane.b32.xlu1 %v840_v51, %s1825_s20 }
 0x151   : > { %v810_v57 = vpop.f32.mrf.mxu1 }
 0x152   : > { %947 = vrot.lane.b32.xlu0 %v841_v55, %s1825_s20  ;;  %883 = vrot.lane.b32.xlu2 %v810_v57, %s1826_s21 }
 0x159   : > { %v813_v0 = vpop.f32.mrf.mxu1 }
 0x15a   : > { %885 = vrot.lane.b32.xlu1 %v813_v0, %s1826_s21  ;;  %949 = vrot.lane.b32.xlu2 %v842_v61, %s1825_s20 }
 0x161   : > { %v816_v5 = vpop.f32.mrf.mxu1 }
 0x162   : > { %887 = vrot.lane.b32.xlu0 %v816_v5, %s1826_s21  ;;  %951 = vrot.lane.b32.xlu1 %v843_v4, %s1825_s20 }
 0x169   : > { %v819_v8 = vpop.f32.mrf.mxu1 }
 0x16a   : > { %953 = vrot.lane.b32.xlu0 %v844_v7, %s1825_s20  ;;  %889 = vrot.lane.b32.xlu2 %v819_v8, %s1826_s21 }
 0x171   : > { %v822_v11 = vpop.f32.mrf.mxu1 }
 0x172   : > { %955 = vrot.lane.b32.xlu2 %v845_v10, %s1825_s20  ;;  %891 = vrot.lane.b32.xlu1 %v822_v11, %s1826_s21 }
 0x179   : > { %v825_v14 = vpop.f32.mrf.mxu1 }
 0x17a   : > { %863 = vrot.lane.b32.xlu2 %v2047_v18, %s1826_s21  ;;  %893 = vrot.lane.b32.xlu0 %v825_v14, %s1826_s21  ;;  %v676_v18 = vpop.f32.mrf.mxu0 }
 0x17b   : > { %957 = vrot.lane.b32.xlu1 %v846_v13, %s1825_s20  ;;  %v1176_v13 = vld [vmem:[%s2502_s7 + $0x70] sm:$0xff] }
 0x17c   : > { %v866_v16 = vpop.permute.xlu1 %865  ;;  %v872_v36 = vpop.permute.xlu2 %871 }
 0x17d   : > { %v980_v19 = vsel %vm978_vm1, %v667_v6, %v866_v16  ;;  %v983_v37 = vsel %vm978_vm1, %v676_v18, %v872_v36  ;;  %v1174_v18 = vld [vmem:[%s2502_s7 + $0x60] sm:$0xff] }
 0x17e   : > { %v997_v20 = vsel %vm995_vm3, %v980_v19, %v930_v15  ;;  %v1175_v19 = vld [vmem:[%s2502_s7 + $0x68] sm:$0xff] }
 0x17f   : > { %v1014_v21 = vsel %vm1012_vm4, %v997_v20, %v2160_v17 }
 0x180   : > { %1068 = vmatmul.f32.vlgmr.msra.gmra.mxu2 %v1014_v21 }
 0x182   : > { %927 = vrot.lane.b32.xlu0 %v831_v23, %s1825_s20  ;;  %v679_v30 = vpop.f32.mrf.mxu0 }
 0x184   : > { %v868_v24 = vpop.permute.xlu1 %867  ;;  %v938_v43 = vpop.permute.xlu2 %937 }
 0x185   : > { %v981_v26 = vsel %vm978_vm1, %v670_v9, %v868_v24  ;;  %v1173_v24 = vld [vmem:[%s2502_s7 + $0x58] sm:$0xff] }
 0x186   : > { %v998_v27 = vsel %vm995_vm3, %v981_v26, %v932_v25  ;;  %v1172_v25 = vld [vmem:[%s2502_s7 + $0x50] sm:$0xff] }
 0x187   : > { %v1015_v29 = vsel %vm1012_vm4, %v998_v27, %v2160_v17 }
 0x188   : > { %1071 = vmatmul.f32.gmra.mxu2 %v1015_v29 }
 0x18a   : > { %v682_v39 = vpop.f32.mrf.mxu0 }
 0x18c   : > { %v870_v31 = vpop.permute.xlu0 %869  ;;  %v934_v32 = vpop.permute.xlu1 %933 }
 0x18d   : > { %v982_v33 = vsel %vm978_vm1, %v673_v12, %v870_v31  ;;  %v1177_v12 = vld [vmem:[%s2502_s7 + $0x78] sm:$0xff] }
 0x18e   : > { %v999_v34 = vsel %vm995_vm3, %v982_v33, %v934_v32  ;;  %1723 = vmatpush.msra.mxu3 %v1177_v12  ;;  %1182 = vmatpush.msrb.mxu1 %v1177_v12  ;;  %v1170_v33 = vld [vmem:[%s2502_s7 + $0x40] sm:$0xff] }
 0x18f   : > { %v1016_v35 = vsel %vm1012_vm4, %v999_v34, %v2160_v17  ;;  %v1169_v34 = vld [vmem:[%s2502_s7 + $0x38] sm:$0xff] }
 0x190   : > { %1074 = vmatmul.f32.gmra.mxu2 %v1016_v35  ;;  %1724 = vmatpush.msra.mxu3 %v1176_v13 }
 0x191   : > { %1183 = vmatpush.msrb.mxu1 %v1176_v13 }
 0x192   : > { %v685_v46 = vpop.f32.mrf.mxu0  ;;  %1725 = vmatpush.msra.mxu3 %v1175_v19 }
 0x193   : > { %1184 = vmatpush.msrb.mxu1 %v1175_v19 }
 0x194   : > { %v936_v38 = vpop.permute.xlu0 %935  ;;  %v878_v28 = vpop.permute.xlu2 %877  ;;  %1726 = vmatpush.msra.mxu3 %v1174_v18 }
 0x195   : > { %v1000_v40 = vsel %vm995_vm3, %v983_v37, %v936_v38  ;;  %v986_v53 = vsel %vm978_vm1, %v685_v46, %v878_v28  ;;  %1185 = vmatpush.msrb.mxu1 %v1174_v18  ;;  %v1168_v37 = vld [vmem:[%s2502_s7 + $0x30] sm:$0xff]  ;;  %v1167_v38 = vld [vmem:[%s2502_s7 + $0x28] sm:$0xff] }
 0x196   : > { %v1017_v41 = vsel %vm1012_vm4, %v1000_v40, %v2160_v17  ;;  %1727 = vmatpush.msra.mxu3 %v1173_v24  ;;  %v1164_v46 = vld [vmem:[%s2502_s7 + $0x10] sm:$0xff] }
 0x197   : > { %1186 = vmatpush.msrb.mxu1 %v1173_v24 }
 0x198   : > { %1077 = vmatmul.f32.gmra.mxu2 %v1017_v41  ;;  %1728 = vmatpush.msra.mxu3 %v1172_v25 }
 0x199   : > { %1187 = vmatpush.msrb.mxu1 %v1172_v25 }
 0x19a   : > { %v688_v52 = vpop.f32.mrf.mxu0 }
 0x19c   : > { %v874_v42 = vpop.permute.xlu1 %873  ;;  %v944_v59 = vpop.permute.xlu2 %943 }
 0x19d   : > { %v984_v44 = vsel %vm978_vm1, %v679_v30, %v874_v42  ;;  %v1171_v30 = vld [vmem:[%s2502_s7 + $0x48] sm:$0xff]  ;;  %v1166_v42 = vld [vmem:[%s2502_s7 + $0x20] sm:$0xff] }
 0x19e   : > { %v1001_v45 = vsel %vm995_vm3, %v984_v44, %v938_v43  ;;  %1729 = vmatpush.msra.mxu3 %v1171_v30  ;;  %1188 = vmatpush.msrb.mxu1 %v1171_v30  ;;  %v1165_v44 = vld [vmem:[%s2502_s7 + $0x18] sm:$0xff] }
 0x19f   : > { %v1018_v47 = vsel %vm1012_vm4, %v1001_v45, %v2160_v17 }
 0x1a0   : > { %1080 = vmatmul.f32.gmra.mxu2 %v1018_v47  ;;  %1730 = vmatpush.msra.mxu3 %v1170_v33 }
 0x1a1   : > { %1189 = vmatpush.msrb.mxu1 %v1170_v33 }
 0x1a2   : > { %v691_v57 = vpop.f32.mrf.mxu0  ;;  %1731 = vmatpush.msra.mxu3 %v1169_v34 }
 0x1a3   : > { %1190 = vmatpush.msrb.mxu1 %v1169_v34 }
 0x1a4   : > { %v876_v48 = vpop.permute.xlu0 %875  ;;  %v940_v49 = vpop.permute.xlu1 %939  ;;  %1732 = vmatpush.msra.mxu3 %v1168_v37 }
 0x1a5   : > { %v985_v50 = vsel %vm978_vm1, %v682_v39, %v876_v48  ;;  %1191 = vmatpush.msrb.mxu1 %v1168_v37  ;;  %v1163_v48 = vld [vmem:[%s2502_s7 + $0x8] sm:$0xff] }
 0x1a6   : > { %v1002_v51 = vsel %vm995_vm3, %v985_v50, %v940_v49  ;;  %1733 = vmatpush.msra.mxu3 %v1167_v38 }
 0x1a7   : > { %v1019_v22 = vsel %vm1012_vm4, %v1002_v51, %v2160_v17  ;;  %1192 = vmatpush.msrb.mxu1 %v1167_v38  ;;  %v1162_v51 = vld [vmem:[%s2502_s7] sm:$0xff] }
 0x1a8   : > { %1083 = vmatmul.f32.gmra.mxu2 %v1019_v22  ;;  %1734 = vmatpush.msra.mxu3 %v1166_v42 }
 0x1a9   : > { %1193 = vmatpush.msrb.mxu1 %v1166_v42 }
 0x1aa   : > { %v694_v0 = vpop.f32.mrf.mxu0  ;;  %1735 = vmatpush.msra.mxu3 %v1165_v44 }
 0x1ab   : > { %1194 = vmatpush.msrb.mxu1 %v1165_v44 }
 0x1ac   : > { %v942_v54 = vpop.permute.xlu0 %941  ;;  %v884_v6 = vpop.permute.xlu2 %883  ;;  %1736 = vmatpush.msra.mxu3 %v1164_v46 }
 0x1ad   : > { %v1003_v55 = vsel %vm995_vm3, %v986_v53, %v942_v54  ;;  %v989_v7 = vsel %vm978_vm1, %v694_v0, %v884_v6  ;;  %1195 = vmatpush.msrb.mxu1 %v1164_v46  ;;  %v2280_v0 = vld [vmem:[%s2501_s6] ss:$0 sm:$0xff] }
 0x1ae   : > { %v1020_v56 = vsel %vm1012_vm4, %v1003_v55, %v2160_v17  ;;  %1737 = vmatpush.msra.mxu3 %v1163_v48 }
 0x1af   : > { %1196 = vmatpush.msrb.mxu1 %v1163_v48 }
 0x1b0   : > { %1086 = vmatmul.f32.gmra.mxu2 %v1020_v56  ;;  %1738 = vmatpush.msra.mxu3 %v1162_v51 }
 0x1b1   : > { %1197 = vmatpush.msrb.mxu1 %v1162_v51 }
 0x1b2   : > { %v697_v9 = vpop.f32.mrf.mxu0 }
 0x1b4   : > { %v880_v58 = vpop.permute.xlu1 %879  ;;  %v950_v15 = vpop.permute.xlu2 %949 }
 0x1b5   : > { %v987_v60 = vsel %vm978_vm1, %v688_v52, %v880_v58 }
 0x1b6   : > { %v1004_v61 = vsel %vm995_vm3, %v987_v60, %v944_v59 }
 0x1b7   : > { %v1021_v62 = vsel %vm1012_vm4, %v1004_v61, %v2160_v17 }
 0x1b8   : > { %1089 = vmatmul.f32.gmra.mxu2 %v1021_v62 }
 0x1ba   : > { %v700_v21 = vpop.f32.mrf.mxu0 }
 0x1bc   : > { %v882_v1 = vpop.permute.xlu0 %881  ;;  %v946_v2 = vpop.permute.xlu1 %945 }
 0x1bd   : > { %v988_v3 = vsel %vm978_vm1, %v691_v57, %v882_v1 }
 0x1be   : > { %v1005_v4 = vsel %vm995_vm3, %v988_v3, %v946_v2 }
 0x1bf   : > { %v1022_v5 = vsel %vm1012_vm4, %v1005_v4, %v2160_v17 }
 0x1c0   : > { %1092 = vmatmul.f32.gmra.mxu2 %v1022_v5 }
 0x1c2   : > { %v703_v36 = vpop.f32.mrf.mxu0 }
 0x1c4   : > { %v948_v8 = vpop.permute.xlu0 %947  ;;  %v890_v35 = vpop.permute.xlu2 %889 }
 0x1c5   : > { %v1006_v10 = vsel %vm995_vm3, %v989_v7, %v948_v8  ;;  %v992_v39 = vsel %vm978_vm1, %v703_v36, %v890_v35 }
 0x1c6   : > { %v1023_v11 = vsel %vm1012_vm4, %v1006_v10, %v2160_v17 }
 0x1c8   : > { %1095 = vmatmul.f32.gmra.mxu2 %v1023_v11 }
 0x1ca   : > { %v706_v45 = vpop.f32.mrf.mxu0 }
 0x1cc   : > { %v886_v14 = vpop.permute.xlu1 %885  ;;  %v956_v49 = vpop.permute.xlu2 %955 }
 0x1cd   : > { %v990_v16 = vsel %vm978_vm1, %v697_v9, %v886_v14 }
 0x1ce   : > { %v1007_v20 = vsel %vm995_vm3, %v990_v16, %v950_v15 }
 0x1cf   : > { %v1024_v23 = vsel %vm1012_vm4, %v1007_v20, %v2160_v17 }
 0x1d0   : > { %1098 = vmatmul.f32.gmra.mxu2 %v1024_v23 }
 0x1d2   : > { %v709_v28 = vpop.f32.mrf.mxu0 }
 0x1d4   : > { %v888_v26 = vpop.permute.xlu0 %887  ;;  %v952_v29 = vpop.permute.xlu1 %951 }
 0x1d5   : > { %v991_v27 = vsel %vm978_vm1, %v700_v21, %v888_v26  ;;  %v864_v58 = vpop.permute.xlu2 %863 }
 0x1d6   : > { %v1008_v31 = vsel %vm995_vm3, %v991_v27, %v952_v29  ;;  %v979_v59 = vsel %vm978_vm1, %v2133_v63, %v864_v58 }
 0x1d7   : > { %v1025_v32 = vsel %vm1012_vm4, %v1008_v31, %v2160_v17 }
 0x1d8   : > { %1101 = vmatmul.f32.gmra.mxu2 %v1025_v32 }
 0x1dc   : > { %v954_v40 = vpop.permute.xlu0 %953 }
 0x1dd   : > { %v1009_v41 = vsel %vm995_vm3, %v992_v39, %v954_v40 }
 0x1de   : > { %v1026_v43 = vsel %vm1012_vm4, %v1009_v41, %v2160_v17 }
 0x1e0   : > { %1104 = vmatmul.f32.gmra.mxu2 %v1026_v43 }
 0x1e4   : > { %v892_v47 = vpop.permute.xlu1 %891 }
 0x1e5   : > { %v993_v50 = vsel %vm978_vm1, %v706_v45, %v892_v47 }
 0x1e6   : > { %v1010_v22 = vsel %vm995_vm3, %v993_v50, %v956_v49 }
 0x1e7   : > { %v1027_v52 = vsel %vm1012_vm4, %v1010_v22, %v2160_v17 }
 0x1e8   : > { %1107 = vmatmul.f32.gmra.mxu2 %v1027_v52 }
 0x1ec   : > { %v894_v53 = vpop.permute.xlu0 %893 }
 0x1ed   : > { %v994_v54 = vsel %vm978_vm1, %v709_v28, %v894_v53  ;;  %v958_v55 = vpop.permute.xlu1 %957 }
 0x1ee   : > { %v1011_v56 = vsel %vm995_vm3, %v994_v54, %v958_v55 }
 0x1ef   : > { %v1028_v57 = vsel %vm1012_vm4, %v1011_v56, %v2160_v17 }
 0x1f0   : > { %1110 = vmatmul.f32.gmra.mxu2 %v1028_v57 }
 0x1f4   : > { %v928_v60 = vpop.permute.xlu0 %927 }
 0x1f5   : > { %v996_v61 = vsel %vm995_vm3, %v979_v59, %v928_v60 }
 0x1f6   : > { %v1013_v62 = vsel %vm1012_vm4, %v996_v61, %v2160_v17 }
 0x1f7   : > { %1065 = vmatmul.f32.vlgmr.msrb.gmra.mxu0 %v1013_v62 }
 0x203   : > { %v1069_v1 = vpop.f32.mrf.mxu2 }
 0x204   : > { %v1070_v2 = vadd.f32 %v2280_v0, %v1069_v1 }
 0x206   : > { %vm1115_vm5 = vcmp.ge.f32.partialorder %v1070_v2, 0.0  ;;  %v1131_v3 = vmul.f32 0.01, %v1070_v2 }
 0x208   : > { %v1147_v4 = vsel %vm1115_vm5, %v1070_v2, %v1131_v3  ;;  %v2301_v2 = vld [vmem:[%s2503_s8] ss:$0 sm:$0xff] }
 0x209   : > { %1201 = vmatmul.f32.vlgmr.msra.gmra.mxu3 %v1147_v4 }
 0x20b   : > { %v1072_v63 = vpop.f32.mrf.mxu2 }
 0x20c   : > { %v1073_v5 = vadd.f32 %v2280_v0, %v1072_v63 }
 0x20e   : > { %vm1116_vm6 = vcmp.ge.f32.partialorder %v1073_v5, 0.0  ;;  %v1132_v6 = vmul.f32 0.01, %v1073_v5 }
 0x210   : > { %v1148_v7 = vsel %vm1116_vm6, %v1073_v5, %v1132_v6 }
 0x211   : > { %1204 = vmatmul.f32.gmra.mxu3 %v1148_v7 }
 0x213   : > { %v1075_v17 = vpop.f32.mrf.mxu2 }
 0x214   : > { %v1076_v8 = vadd.f32 %v2280_v0, %v1075_v17 }
 0x216   : > { %vm1117_vm7 = vcmp.ge.f32.partialorder %v1076_v8, 0.0  ;;  %v1133_v9 = vmul.f32 0.01, %v1076_v8 }
 0x218   : > { %v1149_v10 = vsel %vm1117_vm7, %v1076_v8, %v1133_v9 }
 0x219   : > { %1207 = vmatmul.f32.gmra.mxu3 %v1149_v10 }
 0x21b   : > { %v1078_v11 = vpop.f32.mrf.mxu2 }
 0x21c   : > { %v1079_v12 = vadd.f32 %v2280_v0, %v1078_v11 }
 0x21e   : > { %vm1118_vm8 = vcmp.ge.f32.partialorder %v1079_v12, 0.0  ;;  %v1134_v13 = vmul.f32 0.01, %v1079_v12 }
 0x220   : > { %v1150_v14 = vsel %vm1118_vm8, %v1079_v12, %v1134_v13 }
 0x221   : > { %1210 = vmatmul.f32.gmra.mxu3 %v1150_v14 }
 0x223   : > { %v1081_v15 = vpop.f32.mrf.mxu2 }
 0x224   : > { %v1082_v16 = vadd.f32 %v2280_v0, %v1081_v15 }
 0x226   : > { %vm1119_vm9 = vcmp.ge.f32.partialorder %v1082_v16, 0.0  ;;  %v1135_v19 = vmul.f32 0.01, %v1082_v16 }
 0x228   : > { %v1151_v20 = vsel %vm1119_vm9, %v1082_v16, %v1135_v19 }
 0x229   : > { %1213 = vmatmul.f32.gmra.mxu3 %v1151_v20 }
 0x22b   : > { %v1084_v21 = vpop.f32.mrf.mxu2 }
 0x22c   : > { %v1085_v23 = vadd.f32 %v2280_v0, %v1084_v21 }
 0x22e   : > { %vm1120_vm10 = vcmp.ge.f32.partialorder %v1085_v23, 0.0  ;;  %v1136_v18 = vmul.f32 0.01, %v1085_v23 }
 0x230   : > { %v1152_v24 = vsel %vm1120_vm10, %v1085_v23, %v1136_v18 }
 0x231   : > { %1216 = vmatmul.f32.gmra.mxu3 %v1152_v24 }
 0x233   : > { %v1087_v25 = vpop.f32.mrf.mxu2 }
 0x234   : > { %v1088_v26 = vadd.f32 %v2280_v0, %v1087_v25 }
 0x236   : > { %vm1121_vm11 = vcmp.ge.f32.partialorder %v1088_v26, 0.0  ;;  %v1137_v27 = vmul.f32 0.01, %v1088_v26 }
 0x238   : > { %v1153_v29 = vsel %vm1121_vm11, %v1088_v26, %v1137_v27 }
 0x239   : > { %1219 = vmatmul.f32.gmra.mxu3 %v1153_v29 }
 0x23b   : > { %v1090_v30 = vpop.f32.mrf.mxu2 }
 0x23c   : > { %v1091_v31 = vadd.f32 %v2280_v0, %v1090_v30 }
 0x23e   : > { %vm1122_vm12 = vcmp.ge.f32.partialorder %v1091_v31, 0.0  ;;  %v1138_v32 = vmul.f32 0.01, %v1091_v31 }
 0x240   : > { %v1154_v33 = vsel %vm1122_vm12, %v1091_v31, %v1138_v32 }
 0x241   : > { %1222 = vmatmul.f32.gmra.mxu3 %v1154_v33 }
 0x243   : > { %v1093_v34 = vpop.f32.mrf.mxu2 }
 0x244   : > { %v1094_v35 = vadd.f32 %v2280_v0, %v1093_v34 }
 0x246   : > { %vm1123_vm13 = vcmp.ge.f32.partialorder %v1094_v35, 0.0  ;;  %v1139_v36 = vmul.f32 0.01, %v1094_v35 }
 0x248   : > { %v1155_v37 = vsel %vm1123_vm13, %v1094_v35, %v1139_v36 }
 0x249   : > { %1225 = vmatmul.f32.gmra.mxu3 %v1155_v37 }
 0x24b   : > { %v1096_v38 = vpop.f32.mrf.mxu2 }
 0x24c   : > { %v1097_v39 = vadd.f32 %v2280_v0, %v1096_v38 }
 0x24e   : > { %vm1124_vm14 = vcmp.ge.f32.partialorder %v1097_v39, 0.0  ;;  %v1140_v40 = vmul.f32 0.01, %v1097_v39 }
 0x250   : > { %v1156_v41 = vsel %vm1124_vm14, %v1097_v39, %v1140_v40 }
 0x251   : > { %1228 = vmatmul.f32.gmra.mxu3 %v1156_v41 }
 0x253   : > { %v1099_v42 = vpop.f32.mrf.mxu2 }
 0x254   : > { %v1100_v43 = vadd.f32 %v2280_v0, %v1099_v42  ;;  %v1827_v42 = vmov 32.0  }
 0x255   : > { %1779 = vrcp.f32 %v1827_v42 }
 0x256   : > { %vm1125_vm15 = vcmp.ge.f32.partialorder %v1100_v43, 0.0  ;;  %v1141_v44 = vmul.f32 0.01, %v1100_v43 }
 0x258   : > { %v1157_v45 = vsel %vm1125_vm15, %v1100_v43, %v1141_v44 }
 0x259   : > { %1231 = vmatmul.f32.gmra.mxu3 %v1157_v45 }
 0x25b   : > { %v1102_v46 = vpop.f32.mrf.mxu2  ;;  %v1780_v44 = vpop.eup %1779 }
 0x25c   : > { %v1103_v47 = vadd.f32 %v2280_v0, %v1102_v46  ;;  %v1312_v45 = vmul.f32 32.0, %v1780_v44  ;;  %vm1316_vm6 = vweird.f32 %v1780_v44 }
 0x25e   : > { %vm1126_vm0 = vcmp.ge.f32.partialorder %v1103_v47, 0.0  ;;  %v1142_v48 = vmul.f32 0.01, %v1103_v47 }
 0x260   : > { %v1158_v49 = vsel %vm1126_vm0, %v1103_v47, %v1142_v48 }
 0x261   : > { %1234 = vmatmul.f32.gmra.mxu3 %v1158_v49 }
 0x263   : > { %v1105_v50 = vpop.f32.mrf.mxu2 }
 0x264   : > { %v1106_v51 = vadd.f32 %v2280_v0, %v1105_v50  ;;  %v1313_v50 = vsub.f32 1.0, %v1312_v45 }
 0x266   : > { %vm1127_vm2 = vcmp.ge.f32.partialorder %v1106_v51, 0.0  ;;  %v1143_v22 = vmul.f32 0.01, %v1106_v51 }
 0x268   : > { %v1159_v52 = vsel %vm1127_vm2, %v1106_v51, %v1143_v22 }
 0x269   : > { %1237 = vmatmul.f32.gmra.mxu3 %v1159_v52 }
 0x26b   : > { %v1108_v28 = vpop.f32.mrf.mxu2 }
 0x26c   : > { %v1109_v53 = vadd.f32 %v2280_v0, %v1108_v28  ;;  %v1314_v28 = vmul.f32 %v1780_v44, %v1313_v50 }
 0x26e   : > { %vm1128_vm3 = vcmp.ge.f32.partialorder %v1109_v53, 0.0  ;;  %v1144_v54 = vmul.f32 0.01, %v1109_v53 }
 0x270   : > { %v1160_v55 = vsel %vm1128_vm3, %v1109_v53, %v1144_v54 }
 0x271   : > { %1240 = vmatmul.f32.gmra.mxu3 %v1160_v55 }
 0x273   : > { %v1111_v56 = vpop.f32.mrf.mxu2 }
 0x274   : > { %v1112_v57 = vadd.f32 %v2280_v0, %v1111_v56  ;;  %v1066_v58 = vpop.f32.mrf.mxu0 }
 0x275   : > { %v1067_v59 = vadd.f32 %v2280_v0, %v1066_v58  ;;  %v1315_v58 = vadd.f32 %v1780_v44, %v1314_v28 }
 0x276   : > { %vm1129_vm4 = vcmp.ge.f32.partialorder %v1112_v57, 0.0  ;;  %v1145_v60 = vmul.f32 0.01, %v1112_v57 }
 0x277   : > { %v1130_v61 = vmul.f32 0.01, %v1067_v59  ;;  %vm1114_vm5 = vcmp.ge.f32.partialorder %v1067_v59, 0.0 }
 0x278   : > { %v1161_v62 = vsel %vm1129_vm4, %v1112_v57, %v1145_v60 }
 0x279   : > { %1243 = vmatmul.f32.gmra.mxu3 %v1161_v62  ;;  %v1146_v1 = vsel %vm1114_vm5, %v1067_v59, %v1130_v61  ;;  %v2380_v61 = vsel %vm1316_vm6, %v1780_v44, %v1315_v58 }
 0x27a   : > { %1198 = vmatmul.f32.vlgmr.msrb.gmra.mxu1 %v1146_v1 }
 0x28c   : > { %v1202_v3 = vpop.f32.mrf.mxu3 }
 0x28d   : > { %v2304_v4 = vadd.f32 %v2301_v2, %v1202_v3 }
 0x28f   : > { %v1248_v0 = vmul.f32 %v2304_v4, %v2304_v4 }
 0x291   : > { %v1266_v63 = vsel %vm978_vm1, %v1248_v0, 0.0 }
 0x292   : > { %1267 = vadd.xlane.f32.xlu2 %v1266_v63 }
 0x294   : > { %v1205_v5 = vpop.f32.mrf.mxu3 }
 0x295   : > { %v2310_v6 = vadd.f32 %v2301_v2, %v1205_v5 }
 0x297   : > { %v1249_v7 = vmul.f32 %v2310_v6, %v2310_v6 }
 0x299   : > { %v1269_v17 = vsel %vm978_vm1, %v1249_v7, 0.0 }
 0x29a   : > { %1270 = vadd.xlane.f32.xlu0 %v1269_v17 }
 0x29c   : > { %v1208_v8 = vpop.f32.mrf.mxu3 }
 0x29d   : > { %v2316_v9 = vadd.f32 %v2301_v2, %v1208_v8 }
 0x29f   : > { %v1250_v10 = vmul.f32 %v2316_v9, %v2316_v9 }
 0x2a1   : > { %v1272_v11 = vsel %vm978_vm1, %v1250_v10, 0.0 }
 0x2a2   : > { %1273 = vadd.xlane.f32.xlu2 %v1272_v11 }
 0x2a4   : > { %v1211_v12 = vpop.f32.mrf.mxu3 }
 0x2a5   : > { %v2369_v53 = vadd.f32 %v2301_v2, %v1211_v12 }
 0x2a7   : > { %v1251_v59 = vmul.f32 %v2369_v53, %v2369_v53 }
 0x2a9   : > { %v1275_v1 = vsel %vm978_vm1, %v1251_v59, 0.0 }
 0x2ac   : > { %v1214_v13 = vpop.f32.mrf.mxu3 }
 0x2ad   : > { %v2322_v14 = vadd.f32 %v2301_v2, %v1214_v13 }
 0x2af   : > { %v1252_v15 = vmul.f32 %v2322_v14, %v2322_v14 }
 0x2b1   : > { %v1278_v16 = vsel %vm978_vm1, %v1252_v15, 0.0 }
 0x2b2   : > { %1279 = vadd.xlane.f32.xlu2 %v1278_v16 }
 0x2b4   : > { %v1217_v19 = vpop.f32.mrf.mxu3 }
 0x2b5   : > { %v2328_v20 = vadd.f32 %v2301_v2, %v1217_v19 }
 0x2b7   : > { %v1253_v21 = vmul.f32 %v2328_v20, %v2328_v20 }
 0x2b9   : > { %v1281_v23 = vsel %vm978_vm1, %v1253_v21, 0.0 }
 0x2ba   : > { %1282 = vadd.xlane.f32.xlu0 %v1281_v23 }
 0x2bc   : > { %v1220_v18 = vpop.f32.mrf.mxu3 }
 0x2bd   : > { %v2383_v62 = vadd.f32 %v2301_v2, %v1220_v18 }
 0x2bf   : > { %v1254_v5 = vmul.f32 %v2383_v62, %v2383_v62 }
 0x2c1   : > { %v1284_v17 = vsel %vm978_vm1, %v1254_v5, 0.0 }
 0x2c4   : > { %v1223_v24 = vpop.f32.mrf.mxu3 }
 0x2c5   : > { %v2334_v25 = vadd.f32 %v2301_v2, %v1223_v24 }
 0x2c7   : > { %v1255_v26 = vmul.f32 %v2334_v25, %v2334_v25 }
 0x2c9   : > { %v1287_v27 = vsel %vm978_vm1, %v1255_v26, 0.0 }
 0x2ca   : > { %1288 = vadd.xlane.f32.xlu2 %v1287_v27 }
 0x2cc   : > { %v1226_v29 = vpop.f32.mrf.mxu3 }
 0x2cd   : > { %v2340_v30 = vadd.f32 %v2301_v2, %v1226_v29 }
 0x2cf   : > { %v1256_v31 = vmul.f32 %v2340_v30, %v2340_v30 }
 0x2d1   : > { %v1290_v32 = vsel %vm978_vm1, %v1256_v31, 0.0 }
 0x2d2   : > { %1291 = vadd.xlane.f32.xlu0 %v1290_v32 }
 0x2d4   : > { %v1229_v33 = vpop.f32.mrf.mxu3 }
 0x2d5   : > { %v2390_v7 = vadd.f32 %v2301_v2, %v1229_v33 }
 0x2d7   : > { %v1257_v13 = vmul.f32 %v2390_v7, %v2390_v7 }
 0x2d9   : > { %v1293_v21 = vsel %vm978_vm1, %v1257_v13, 0.0 }
 0x2dc   : > { %v1232_v34 = vpop.f32.mrf.mxu3 }
 0x2dd   : > { %v2346_v35 = vadd.f32 %v2301_v2, %v1232_v34 }
 0x2df   : > { %v1258_v36 = vmul.f32 %v2346_v35, %v2346_v35 }
 0x2e1   : > { %v1296_v37 = vsel %vm978_vm1, %v1258_v36, 0.0 }
 0x2e2   : > { %1297 = vadd.xlane.f32.xlu2 %v1296_v37 }
 0x2e4   : > { %v1235_v38 = vpop.f32.mrf.mxu3 }
 0x2e5   : > { %v2352_v39 = vadd.f32 %v2301_v2, %v1235_v38 }
 0x2e7   : > { %v1259_v40 = vmul.f32 %v2352_v39, %v2352_v39 }
 0x2e9   : > { %v1299_v41 = vsel %vm978_vm1, %v1259_v40, 0.0 }
 0x2ea   : > { %1300 = vadd.xlane.f32.xlu0 %v1299_v41 }
 0x2ec   : > { %v1238_v43 = vpop.f32.mrf.mxu3 }
 0x2ed   : > { %v2397_v19 = vadd.f32 %v2301_v2, %v1238_v43 }
 0x2ef   : > { %v1260_v31 = vmul.f32 %v2397_v19, %v2397_v19 }
 0x2f1   : > { %v1302_v38 = vsel %vm978_vm1, %v1260_v31, 0.0 }
 0x2f4   : > { %v1241_v46 = vpop.f32.mrf.mxu3 }
 0x2f5   : > { %v2358_v47 = vadd.f32 %v2301_v2, %v1241_v46 }
 0x2f7   : > { %v1199_v48 = vpop.f32.mrf.mxu1  ;;  %v1261_v49 = vmul.f32 %v2358_v47, %v2358_v47 }
 0x2f8   : > { %v2363_v51 = vadd.f32 %v2301_v2, %v1199_v48 }
 0x2f9   : > { %v1305_v22 = vsel %vm978_vm1, %v1261_v49, 0.0 }
 0x2fa   : > { %1306 = vadd.xlane.f32.xlu2 %v1305_v22  ;;  %v1247_v52 = vmul.f32 %v2363_v51, %v2363_v51 }
 0x2fc   : > { %v1244_v54 = vpop.f32.mrf.mxu3  ;;  %v1263_v55 = vsel %vm978_vm1, %v1247_v52, 0.0 }
 0x2fd   : > { %v2373_v56 = vadd.f32 %v2301_v2, %v1244_v54  ;;  %1264 = vadd.xlane.f32.xlu1 %v1263_v55  ;;  %v2406_v2 = vld [vmem:[%s2504_s9] ss:$0 sm:$0xff] }
 0x2ff   : > { %v1262_v57 = vmul.f32 %v2373_v56, %v2373_v56 }
 0x301   : > { %v1308_v60 = vsel %vm978_vm1, %v1262_v57, 0.0 }
 0x302   : > { %1309 = vadd.xlane.f32.xlu0 %v1308_v60 }
 0x305   : > { %v1268_v3 = vpop.xlane.xlu2 %1267  ;;  %1276 = vadd.xlane.f32.xlu1 %v1275_v1 }
 0x306   : > { %v1319_v0 = vmul.f32 %v2380_v61, %v1268_v3 }
 0x308   : > { %v1335_v63 = vadd.f32 1.1920929e-07, %v1319_v0 }
 0x30a   : > { %1781 = vrsqrt.f32 %v1335_v63  ;;  %vm1366_vm8 = vweird.f32 %v1335_v63 }
 0x30d   : > { %1285 = vadd.xlane.f32.xlu1 %v1284_v17  ;;  %v1271_v8 = vpop.xlane.xlu0 %1270 }
 0x30e   : > { %v1320_v10 = vmul.f32 %v2380_v61, %v1271_v8 }
 0x310   : > { %v1782_v11 = vpop.eup %1781  ;;  %v1336_v12 = vadd.f32 1.1920929e-07, %v1320_v10 }
 0x311   : > { %v1361_v15 = vmul.f32 %v1782_v11, %v1335_v63  ;;  %vm1367_vm7 = vweird.f32 %v1782_v11 }
 0x312   : > { %1783 = vrsqrt.f32 %v1336_v12  ;;  %vm1368_vm9 = vmor %vm1366_vm8, %vm1367_vm7  ;;  %vm1376_vm11 = vweird.f32 %v1336_v12 }
 0x313   : > { %v1362_v16 = vmul.f32 %v1782_v11, %v1361_v15 }
 0x315   : > { %v1363_v23 = vmul.f32 0.5, %v1362_v16  ;;  %v1274_v18 = vpop.xlane.xlu2 %1273  ;;  %1294 = vadd.xlane.f32.xlu1 %v1293_v21 }
 0x316   : > { %v1321_v24 = vmul.f32 %v2380_v61, %v1274_v18 }
 0x317   : > { %v1364_v26 = vsub.f32 1.5, %v1363_v23 }
 0x318   : > { %v1784_v27 = vpop.eup %1783  ;;  %v1337_v29 = vadd.f32 1.1920929e-07, %v1321_v24 }
 0x319   : > { %v1365_v32 = vmul.f32 %v1782_v11, %v1364_v26  ;;  %v1371_v33 = vmul.f32 %v1784_v27, %v1336_v12  ;;  %vm1377_vm10 = vweird.f32 %v1784_v27 }
 0x31a   : > { %1785 = vrsqrt.f32 %v1337_v29  ;;  %vm1378_vm12 = vmor %vm1376_vm11, %vm1377_vm10  ;;  %vm1386_vm14 = vweird.f32 %v1337_v29 }
 0x31b   : > { %v1369_v34 = vsel %vm1368_vm9, %v1782_v11, %v1365_v32  ;;  %v1372_v36 = vmul.f32 %v1784_v27, %v1371_v33 }
 0x31c   : > { %v1511_v37 = vmul.f32 %v1369_v34, %v2304_v4 }
 0x31d   : > { %v1373_v40 = vmul.f32 0.5, %v1372_v36  ;;  %1303 = vadd.xlane.f32.xlu1 %v1302_v38 }
 0x31e   : > { %v1531_v41 = vmul.f32 %v2406_v2, %v1511_v37 }
 0x31f   : > { %v1374_v42 = vsub.f32 1.5, %v1373_v40 }
 0x320   : > { %v1786_v43 = vpop.eup %1785  ;;  %1547 = vst.msk [vmem:[%s2414_s25 + $0x8] sm:$0xff] %vm978_vm1, %v1531_v41 }
 0x321   : > { %v1375_v44 = vmul.f32 %v1784_v27, %v1374_v42  ;;  %v1381_v4 = vmul.f32 %v1786_v43, %v1337_v29  ;;  %vm1387_vm13 = vweird.f32 %v1786_v43 }
 0x322   : > { %vm1388_vm15 = vmor %vm1386_vm14, %vm1387_vm13 }
 0x323   : > { %v1379_v45 = vsel %vm1378_vm12, %v1784_v27, %v1375_v44  ;;  %v1382_v46 = vmul.f32 %v1786_v43, %v1381_v4 }
 0x324   : > { %v1512_v48 = vmul.f32 %v1379_v45, %v2310_v6 }
 0x325   : > { %v1383_v49 = vmul.f32 0.5, %v1382_v46  ;;  %v1280_v50 = vpop.xlane.xlu2 %1279 }
 0x326   : > { %v1532_v22 = vmul.f32 %v2406_v2, %v1512_v48  ;;  %v1323_v52 = vmul.f32 %v2380_v61, %v1280_v50 }
 0x327   : > { %v1384_v28 = vsub.f32 1.5, %v1383_v49 }
 0x328   : > { %1548 = vst.msk [vmem:[%s2414_s25 + $0x10] sm:$0xff] %vm978_vm1, %v1532_v22  ;;  %v1339_v54 = vadd.f32 1.1920929e-07, %v1323_v52 }
 0x329   : > { %v1385_v55 = vmul.f32 %v1786_v43, %v1384_v28 }
 0x32a   : > { %1787 = vrsqrt.f32 %v1339_v54  ;;  %vm1406_vm2 = vweird.f32 %v1339_v54 }
 0x32b   : > { %v1389_v57 = vsel %vm1388_vm15, %v1786_v43, %v1385_v55 }
 0x32c   : > { %v1513_v58 = vmul.f32 %v1389_v57, %v2316_v9 }
 0x32d   : > { %v1283_v6 = vpop.xlane.xlu0 %1282 }
 0x32e   : > { %v1533_v59 = vmul.f32 %v2406_v2, %v1513_v58  ;;  %v1324_v60 = vmul.f32 %v2380_v61, %v1283_v6 }
 0x330   : > { %v1788_v1 = vpop.eup %1787  ;;  %1549 = vst.msk [vmem:[%s2414_s25 + $0x18] sm:$0xff] %vm978_vm1, %v1533_v59  ;;  %v1340_v3 = vadd.f32 1.1920929e-07, %v1324_v60 }
 0x331   : > { %v1401_v0 = vmul.f32 %v1788_v1, %v1339_v54  ;;  %vm1407_vm0 = vweird.f32 %v1788_v1 }
 0x332   : > { %1789 = vrsqrt.f32 %v1340_v3  ;;  %vm1408_vm3 = vmor %vm1406_vm2, %vm1407_vm0  ;;  %vm1416_vm5 = vweird.f32 %v1340_v3 }
 0x333   : > { %v1402_v63 = vmul.f32 %v1788_v1, %v1401_v0 }
 0x335   : > { %v1403_v5 = vmul.f32 0.5, %v1402_v63 }
 0x337   : > { %v1404_v17 = vsub.f32 1.5, %v1403_v5 }
 0x338   : > { %v1790_v8 = vpop.eup %1789 }
 0x339   : > { %v1405_v10 = vmul.f32 %v1788_v1, %v1404_v17  ;;  %v1411_v9 = vmul.f32 %v1790_v8, %v1340_v3  ;;  %vm1417_vm4 = vweird.f32 %v1790_v8 }
 0x33a   : > { %vm1418_vm6 = vmor %vm1416_vm5, %vm1417_vm4 }
 0x33b   : > { %v1409_v11 = vsel %vm1408_vm3, %v1788_v1, %v1405_v10  ;;  %v1412_v12 = vmul.f32 %v1790_v8, %v1411_v9 }
 0x33c   : > { %v1515_v13 = vmul.f32 %v1409_v11, %v2322_v14 }
 0x33d   : > { %v1413_v15 = vmul.f32 0.5, %v1412_v12  ;;  %v1289_v16 = vpop.xlane.xlu2 %1288 }
 0x33e   : > { %v1535_v21 = vmul.f32 %v2406_v2, %v1515_v13  ;;  %v1326_v23 = vmul.f32 %v2380_v61, %v1289_v16 }
 0x33f   : > { %v1414_v18 = vsub.f32 1.5, %v1413_v15 }
 0x340   : > { %1551 = vst.msk [vmem:[%s2414_s25 + $0x28] sm:$0xff] %vm978_vm1, %v1535_v21  ;;  %v1342_v24 = vadd.f32 1.1920929e-07, %v1326_v23 }
 0x341   : > { %v1415_v26 = vmul.f32 %v1790_v8, %v1414_v18 }
 0x342   : > { %1791 = vrsqrt.f32 %v1342_v24  ;;  %vm1436_vm8 = vweird.f32 %v1342_v24 }
 0x343   : > { %v1419_v27 = vsel %vm1418_vm6, %v1790_v8, %v1415_v26 }
 0x344   : > { %v1516_v29 = vmul.f32 %v1419_v27, %v2328_v20 }
 0x345   : > { %v1292_v14 = vpop.xlane.xlu0 %1291 }
 0x346   : > { %v1536_v31 = vmul.f32 %v2406_v2, %v1516_v29  ;;  %v1327_v32 = vmul.f32 %v2380_v61, %v1292_v14 }
 0x348   : > { %v1792_v33 = vpop.eup %1791  ;;  %1552 = vst.msk [vmem:[%s2414_s25 + $0x30] sm:$0xff] %vm978_vm1, %v1536_v31  ;;  %v1343_v34 = vadd.f32 1.1920929e-07, %v1327_v32 }
 0x349   : > { %v1431_v36 = vmul.f32 %v1792_v33, %v1342_v24  ;;  %vm1437_vm7 = vweird.f32 %v1792_v33 }
 0x34a   : > { %1793 = vrsqrt.f32 %v1343_v34  ;;  %vm1438_vm9 = vmor %vm1436_vm8, %vm1437_vm7  ;;  %vm1446_vm11 = vweird.f32 %v1343_v34 }
 0x34b   : > { %v1432_v37 = vmul.f32 %v1792_v33, %v1431_v36 }
 0x34d   : > { %v1433_v38 = vmul.f32 0.5, %v1432_v37 }
 0x34f   : > { %v1434_v40 = vsub.f32 1.5, %v1433_v38 }
 0x350   : > { %v1794_v41 = vpop.eup %1793 }
 0x351   : > { %v1435_v42 = vmul.f32 %v1792_v33, %v1434_v40  ;;  %v1441_v20 = vmul.f32 %v1794_v41, %v1343_v34  ;;  %vm1447_vm10 = vweird.f32 %v1794_v41 }
 0x352   : > { %vm1448_vm12 = vmor %vm1446_vm11, %vm1447_vm10 }
 0x353   : > { %v1439_v43 = vsel %vm1438_vm9, %v1792_v33, %v1435_v42  ;;  %v1442_v44 = vmul.f32 %v1794_v41, %v1441_v20 }
 0x354   : > { %v1518_v4 = vmul.f32 %v1439_v43, %v2334_v25 }
 0x355   : > { %v1443_v45 = vmul.f32 0.5, %v1442_v44  ;;  %v1298_v46 = vpop.xlane.xlu2 %1297 }
 0x356   : > { %v1538_v48 = vmul.f32 %v2406_v2, %v1518_v4  ;;  %v1329_v49 = vmul.f32 %v2380_v61, %v1298_v46 }
 0x357   : > { %v1444_v50 = vsub.f32 1.5, %v1443_v45 }
 0x358   : > { %1554 = vst.msk [vmem:[%s2414_s25 + $0x40] sm:$0xff] %vm978_vm1, %v1538_v48  ;;  %v1345_v22 = vadd.f32 1.1920929e-07, %v1329_v49 }
 0x359   : > { %v1445_v52 = vmul.f32 %v1794_v41, %v1444_v50 }
 0x35a   : > { %1795 = vrsqrt.f32 %v1345_v22  ;;  %vm1466_vm14 = vweird.f32 %v1345_v22 }
 0x35b   : > { %v1449_v28 = vsel %vm1448_vm12, %v1794_v41, %v1445_v52 }
 0x35c   : > { %v1519_v54 = vmul.f32 %v1449_v28, %v2340_v30 }
 0x35d   : > { %v1301_v25 = vpop.xlane.xlu0 %1300 }
 0x35e   : > { %v1539_v55 = vmul.f32 %v2406_v2, %v1519_v54  ;;  %v1330_v57 = vmul.f32 %v2380_v61, %v1301_v25 }
 0x360   : > { %v1796_v58 = vpop.eup %1795  ;;  %1555 = vst.msk [vmem:[%s2414_s25 + $0x48] sm:$0xff] %vm978_vm1, %v1539_v55  ;;  %v1346_v6 = vadd.f32 1.1920929e-07, %v1330_v57 }
 0x361   : > { %v1461_v59 = vmul.f32 %v1796_v58, %v1345_v22  ;;  %vm1467_vm13 = vweird.f32 %v1796_v58 }
 0x362   : > { %1797 = vrsqrt.f32 %v1346_v6  ;;  %vm1468_vm15 = vmor %vm1466_vm14, %vm1467_vm13  ;;  %vm1476_vm2 = vweird.f32 %v1346_v6 }
 0x363   : > { %v1462_v60 = vmul.f32 %v1796_v58, %v1461_v59 }
 0x365   : > { %v1463_v1 = vmul.f32 0.5, %v1462_v60 }
 0x367   : > { %v1464_v3 = vsub.f32 1.5, %v1463_v1 }
 0x368   : > { %v1798_v0 = vpop.eup %1797 }
 0x369   : > { %v1465_v63 = vmul.f32 %v1796_v58, %v1464_v3  ;;  %v1471_v30 = vmul.f32 %v1798_v0, %v1346_v6  ;;  %vm1477_vm0 = vweird.f32 %v1798_v0 }
 0x36a   : > { %vm1478_vm3 = vmor %vm1476_vm2, %vm1477_vm0 }
 0x36b   : > { %v1469_v5 = vsel %vm1468_vm15, %v1796_v58, %v1465_v63  ;;  %v1472_v17 = vmul.f32 %v1798_v0, %v1471_v30 }
 0x36c   : > { %v1521_v8 = vmul.f32 %v1469_v5, %v2346_v35 }
 0x36d   : > { %v1473_v10 = vmul.f32 0.5, %v1472_v17  ;;  %v1307_v9 = vpop.xlane.xlu2 %1306 }
 0x36e   : > { %v1541_v11 = vmul.f32 %v2406_v2, %v1521_v8  ;;  %v1332_v12 = vmul.f32 %v2380_v61, %v1307_v9 }
 0x36f   : > { %v1474_v13 = vsub.f32 1.5, %v1473_v10 }
 0x370   : > { %1557 = vst.msk [vmem:[%s2414_s25 + $0x58] sm:$0xff] %vm978_vm1, %v1541_v11  ;;  %v1348_v15 = vadd.f32 1.1920929e-07, %v1332_v12  ;;  %v1265_v16 = vpop.xlane.xlu1 %1264 }
 0x371   : > { %v1475_v21 = vmul.f32 %v1798_v0, %v1474_v13  ;;  %v1318_v23 = vmul.f32 %v2380_v61, %v1265_v16 }
 0x372   : > { %1799 = vrsqrt.f32 %v1348_v15  ;;  %vm1496_vm5 = vweird.f32 %v1348_v15 }
 0x373   : > { %v1479_v35 = vsel %vm1478_vm3, %v1798_v0, %v1475_v21  ;;  %v1334_v18 = vadd.f32 1.1920929e-07, %v1318_v23 }
 0x374   : > { %v1522_v24 = vmul.f32 %v1479_v35, %v2352_v39 }
 0x375   : > { %1801 = vrsqrt.f32 %v1334_v18  ;;  %v1310_v26 = vpop.xlane.xlu0 %1309  ;;  %vm1356_vm8 = vweird.f32 %v1334_v18 }
 0x376   : > { %v1542_v27 = vmul.f32 %v2406_v2, %v1522_v24  ;;  %v1333_v29 = vmul.f32 %v2380_v61, %v1310_v26 }
 0x378   : > { %v1800_v14 = vpop.eup %1799  ;;  %1558 = vst.msk [vmem:[%s2414_s25 + $0x60] sm:$0xff] %vm978_vm1, %v1542_v27  ;;  %v1349_v31 = vadd.f32 1.1920929e-07, %v1333_v29  ;;  %v1277_v32 = vpop.xlane.xlu1 %1276 }
 0x379   : > { %v1491_v33 = vmul.f32 %v1800_v14, %v1348_v15  ;;  %v1322_v34 = vmul.f32 %v2380_v61, %v1277_v32  ;;  %vm1497_vm4 = vweird.f32 %v1800_v14 }
 0x37a   : > { %1803 = vrsqrt.f32 %v1349_v31  ;;  %vm1498_vm6 = vmor %vm1496_vm5, %vm1497_vm4  ;;  %vm1506_vm11 = vweird.f32 %v1349_v31 }
 0x37b   : > { %v1802_v36 = vpop.eup %1801  ;;  %v1492_v37 = vmul.f32 %v1800_v14, %v1491_v33  ;;  %v1338_v38 = vadd.f32 1.1920929e-07, %v1322_v34 }
 0x37c   : > { %v1351_v40 = vmul.f32 %v1802_v36, %v1334_v18  ;;  %vm1357_vm7 = vweird.f32 %v1802_v36 }
 0x37d   : > { %v1493_v39 = vmul.f32 0.5, %v1492_v37  ;;  %1805 = vrsqrt.f32 %v1338_v38  ;;  %vm1358_vm9 = vmor %vm1356_vm8, %vm1357_vm7  ;;  %vm1396_vm14 = vweird.f32 %v1338_v38 }
 0x37e   : > { %v1352_v41 = vmul.f32 %v1802_v36, %v1351_v40 }
 0x37f   : > { %v1494_v42 = vsub.f32 1.5, %v1493_v39 }
 0x380   : > { %v1804_v20 = vpop.eup %1803  ;;  %v1353_v43 = vmul.f32 0.5, %v1352_v41  ;;  %v1286_v44 = vpop.xlane.xlu1 %1285 }
 0x381   : > { %v1495_v4 = vmul.f32 %v1800_v14, %v1494_v42  ;;  %v1501_v45 = vmul.f32 %v1804_v20, %v1349_v31  ;;  %v1325_v46 = vmul.f32 %v2380_v61, %v1286_v44  ;;  %vm1507_vm10 = vweird.f32 %v1804_v20 }
 0x382   : > { %v1354_v48 = vsub.f32 1.5, %v1353_v43  ;;  %vm1508_vm12 = vmor %vm1506_vm11, %vm1507_vm10 }
 0x383   : > { %v1806_v49 = vpop.eup %1805  ;;  %v1499_v50 = vsel %vm1498_vm6, %v1800_v14, %v1495_v4  ;;  %v1502_v22 = vmul.f32 %v1804_v20, %v1501_v45  ;;  %v1341_v52 = vadd.f32 1.1920929e-07, %v1325_v46 }
 0x384   : > { %v1524_v28 = vmul.f32 %v1499_v50, %v2358_v47  ;;  %v1355_v54 = vmul.f32 %v1802_v36, %v1354_v48  ;;  %v1391_v25 = vmul.f32 %v1806_v49, %v1338_v38  ;;  %vm1397_vm13 = vweird.f32 %v1806_v49 }
 0x385   : > { %v1503_v55 = vmul.f32 0.5, %v1502_v22  ;;  %1807 = vrsqrt.f32 %v1341_v52  ;;  %vm1398_vm15 = vmor %vm1396_vm14, %vm1397_vm13  ;;  %vm1426_vm2 = vweird.f32 %v1341_v52 }
 0x386   : > { %v1544_v57 = vmul.f32 %v2406_v2, %v1524_v28  ;;  %v1359_v58 = vsel %vm1358_vm9, %v1802_v36, %v1355_v54  ;;  %v1392_v6 = vmul.f32 %v1806_v49, %v1391_v25 }
 0x387   : > { %v1510_v59 = vmul.f32 %v1359_v58, %v2363_v51  ;;  %v1504_v60 = vsub.f32 1.5, %v1503_v55 }
 0x388   : > { %1560 = vst.msk [vmem:[%s2414_s25 + $0x70] sm:$0xff] %vm978_vm1, %v1544_v57  ;;  %v1393_v1 = vmul.f32 0.5, %v1392_v6  ;;  %v1295_v3 = vpop.xlane.xlu1 %1294 }
 0x389   : > { %v1530_v47 = vmul.f32 %v2406_v2, %v1510_v59  ;;  %v1505_v0 = vmul.f32 %v1804_v20, %v1504_v60  ;;  %v1328_v63 = vmul.f32 %v2380_v61, %v1295_v3 }
 0x38a   : > { %v1394_v30 = vsub.f32 1.5, %v1393_v1 }
 0x38b   : > { %v1808_v5 = vpop.eup %1807  ;;  %1546 = vst.msk [vmem:[%s2414_s25] sm:$0xff] %vm978_vm1, %v1530_v47  ;;  %v1509_v51 = vsel %vm1508_vm12, %v1804_v20, %v1505_v0  ;;  %v1344_v17 = vadd.f32 1.1920929e-07, %v1328_v63 }
 0x38c   : > { %v1525_v8 = vmul.f32 %v1509_v51, %v2373_v56  ;;  %v1395_v10 = vmul.f32 %v1806_v49, %v1394_v30  ;;  %v1421_v9 = vmul.f32 %v1808_v5, %v1341_v52  ;;  %vm1427_vm0 = vweird.f32 %v1808_v5 }
 0x38d   : > { %1809 = vrsqrt.f32 %v1344_v17  ;;  %vm1428_vm3 = vmor %vm1426_vm2, %vm1427_vm0  ;;  %vm1456_vm5 = vweird.f32 %v1344_v17 }
 0x38e   : > { %v1545_v11 = vmul.f32 %v2406_v2, %v1525_v8  ;;  %v1399_v12 = vsel %vm1398_vm15, %v1806_v49, %v1395_v10  ;;  %v1422_v13 = vmul.f32 %v1808_v5, %v1421_v9 }
 0x38f   : > { %v1514_v15 = vmul.f32 %v1399_v12, %v2369_v53 }
 0x390   : > { %1561 = vst.msk [vmem:[%s2414_s25 + $0x78] sm:$0xff] %vm978_vm1, %v1545_v11  ;;  %v1423_v16 = vmul.f32 0.5, %v1422_v13  ;;  %v1304_v21 = vpop.xlane.xlu1 %1303 }
 0x391   : > { %v1534_v23 = vmul.f32 %v2406_v2, %v1514_v15  ;;  %v1331_v56 = vmul.f32 %v2380_v61, %v1304_v21 }
 0x392   : > { %v1424_v35 = vsub.f32 1.5, %v1423_v16 }
 0x393   : > { %v1810_v18 = vpop.eup %1809  ;;  %1550 = vst.msk [vmem:[%s2414_s25 + $0x20] sm:$0xff] %vm978_vm1, %v1534_v23  ;;  %v1347_v24 = vadd.f32 1.1920929e-07, %v1331_v56 }
 0x394   : > { %v1425_v26 = vmul.f32 %v1808_v5, %v1424_v35  ;;  %v1451_v27 = vmul.f32 %v1810_v18, %v1344_v17  ;;  %vm1457_vm4 = vweird.f32 %v1810_v18 }
 0x395   : > { %1811 = vrsqrt.f32 %v1347_v24  ;;  %vm1458_vm6 = vmor %vm1456_vm5, %vm1457_vm4  ;;  %vm1486_vm8 = vweird.f32 %v1347_v24 }
 0x396   : > { %v1429_v53 = vsel %vm1428_vm3, %v1808_v5, %v1425_v26  ;;  %v1452_v29 = vmul.f32 %v1810_v18, %v1451_v27 }
 0x397   : > { %v1517_v14 = vmul.f32 %v1429_v53, %v2383_v62 }
 0x398   : > { %v1453_v31 = vmul.f32 0.5, %v1452_v29 }
 0x399   : > { %v1537_v32 = vmul.f32 %v2406_v2, %v1517_v14 }
 0x39a   : > { %v1454_v61 = vsub.f32 1.5, %v1453_v31 }
 0x39b   : > { %v1812_v33 = vpop.eup %1811  ;;  %1553 = vst.msk [vmem:[%s2414_s25 + $0x38] sm:$0xff] %vm978_vm1, %v1537_v32 }
 0x39c   : > { %v1455_v34 = vmul.f32 %v1810_v18, %v1454_v61  ;;  %v1481_v36 = vmul.f32 %v1812_v33, %v1347_v24  ;;  %vm1487_vm7 = vweird.f32 %v1812_v33 }
 0x39d   : > { %vm1488_vm9 = vmor %vm1486_vm8, %vm1487_vm7 }
 0x39e   : > { %v1459_v37 = vsel %vm1458_vm6, %v1810_v18, %v1455_v34  ;;  %v1482_v38 = vmul.f32 %v1812_v33, %v1481_v36 }
 0x39f   : > { %v1520_v40 = vmul.f32 %v1459_v37, %v2390_v7 }
 0x3a0   : > { %v1483_v39 = vmul.f32 0.5, %v1482_v38 }
 0x3a1   : > { %v1540_v62 = vmul.f32 %v2406_v2, %v1520_v40 }
 0x3a2   : > { %v1484_v41 = vsub.f32 1.5, %v1483_v39 }
 0x3a3   : > { %1556 = vst.msk [vmem:[%s2414_s25 + $0x50] sm:$0xff] %vm978_vm1, %v1540_v62 }
 0x3a4   : > { %v1485_v42 = vmul.f32 %v1812_v33, %v1484_v41 }
 0x3a6   : > { %v1489_v20 = vsel %vm1488_vm9, %v1812_v33, %v1485_v42 }
 0x3a7   : > { %v1523_v43 = vmul.f32 %v1489_v20, %v2397_v19 }
 0x3a9   : > { %v1543_v44 = vmul.f32 %v2406_v2, %v1523_v43 }
 0x3ab   : > { %1559 = vst.msk [vmem:[%s2414_s25 + $0x68] sm:$0xff] %vm978_vm1, %v1543_v44 }
 0x3ac PF: > { %s20_s13 = sadd.s32 1, %s1819_s13  }
 0x3ad   : > { %p17_p4 = scmp.ge.s32.totalorder %s20_s13, 4  }
 0x3af   :  { %19 = sbr.rel (!%p17_p4) target bundleno = 1 (0x1), region = 93 }

</bundles_post_ra>
